<compile_context>
chip_gen: v7x
topology: tpu7x:2x2x1
jax: 0.10.0
libtpu: 0.0.40
codegen_flags: <defaults>
</compile_context>

<pallas_src>
import jax
import jax.numpy as jnp
from jax import lax
from jax.experimental import pallas as pl
from jax.experimental.pallas import tpu as pltpu


def bottleneck_kernel(x_ref, w1_ref, w2_ref, w3_ref, b1_ref, b2_ref, b3_ref,
                      o_ref, h1p_ref):
    H, W, Cin = x_ref.shape            # full image block (batch dim squeezed)
    TH = o_ref.shape[0]                # row-tile height
    Cout = o_ref.shape[2]
    Pp = w1_ref.shape[1]               # lane-dense (padded) bottleneck width
    nj = H // TH                       # static

    j = pl.program_id(1)
    row0 = pl.multiple_of(j * TH, TH)

    # ---- zero ONLY the padding border of the scratch ----
    # Interior columns 1..W are fully overwritten by conv1 below; the padding
    # columns 0 and W+1 are zeroed every step (cheap), the padding rows only
    # at the image border (under pl.when).  Safe under megacore: no reliance
    # on cross-step scratch state.
    zcol = jnp.zeros((TH + 2, 1, Pp), jnp.bfloat16)
    h1p_ref[pl.ds(0, TH + 2), pl.ds(0, 1), :] = zcol
    h1p_ref[pl.ds(0, TH + 2), pl.ds(W + 1, 1), :] = zcol
    zrow = jnp.zeros((1, W, Pp), jnp.bfloat16)

    w1 = w1_ref[...]                   # (Cin, Pp) bf16, BN scale folded in
    b1 = b1_ref[...]                   # (1, Pp) f32

    def conv1_bias_relu(rows_f32):     # (R, W, Cin) f32 -> (R, W, Pp) bf16
        r = rows_f32.shape[0]
        h = jnp.dot(rows_f32.reshape(r * W, Cin).astype(jnp.bfloat16), w1,
                    preferred_element_type=jnp.float32)
        h = jnp.maximum(h + b1, 0.0)
        return h.astype(jnp.bfloat16).reshape(r, W, Pp)

    # ---- conv1 (1x1) + bn1 + relu: one matmul covering tile + row halo ----
    if nj == 1:
        # Whole image in one tile: no halo rows exist, zero both border rows.
        h1 = conv1_bias_relu(x_ref[pl.ds(0, TH)])
        h1p_ref[pl.ds(1, TH), pl.ds(1, W), :] = h1
        h1p_ref[pl.ds(0, 1), pl.ds(1, W), :] = zrow
        h1p_ref[pl.ds(TH + 1, 1), pl.ds(1, W), :] = zrow
    else:
        R = TH + 2
        # Clamped slab start: always R valid rows, one MXU matmul.
        s = jnp.minimum(jnp.maximum(row0 - 1, 0), H - R)
        h1 = conv1_bias_relu(x_ref[pl.ds(s, R)])                  # (R, W, Pp)

        is_top = j == 0
        is_bot = j == nj - 1

        @pl.when(jnp.logical_and(j > 0, j < nj - 1))
        def _mid():
            h1p_ref[pl.ds(0, R), pl.ds(1, W), :] = h1

        @pl.when(is_top)
        def _top():   # slab starts at row0 (clamped); discard last slab row
            h1p_ref[pl.ds(1, TH + 1), pl.ds(1, W), :] = h1[:TH + 1]
            h1p_ref[pl.ds(0, 1), pl.ds(1, W), :] = zrow

        @pl.when(is_bot)
        def _bot():   # slab starts at row0-2 (clamped); discard first slab row
            h1p_ref[pl.ds(0, TH + 1), pl.ds(1, W), :] = h1[1:]
            h1p_ref[pl.ds(TH + 1, 1), pl.ds(1, W), :] = zrow

    # ---- conv2 (3x3, stride=1, pad=1) + bn2 + relu: 9 shifted MXU matmuls ----
    acc = None
    for kh in range(3):
        for kw in range(3):
            patch = h1p_ref[pl.ds(kh, TH), pl.ds(kw, W), :]       # (TH, W, Pp) bf16
            t = jnp.dot(patch.reshape(TH * W, Pp), w2_ref[kh, kw],
                        preferred_element_type=jnp.float32)
            acc = t if acc is None else acc + t                   # init from 1st tap
    h2 = jnp.maximum(acc + b2_ref[...], 0.0).astype(jnp.bfloat16)

    # ---- conv3 (1x1) + bn3 + residual add + relu ----
    h3 = jnp.dot(h2, w3_ref[...], preferred_element_type=jnp.float32) + b3_ref[...]
    # Fresh load of the residual rows here (not kept live across conv2).
    res = x_ref[pl.ds(row0, TH)].reshape(TH * W, Cin)
    out = jnp.maximum(h3 + res.astype(jnp.float32), 0.0)
    o_ref[...] = out.reshape(TH, W, Cout).astype(o_ref.dtype)


def bottleneck_pallas(x_nhwc, params, *, tile_h=None):
    w1, w2, w3, s1, b1, s2, b2, s3, b3 = params
    N, H, W, Cin = x_nhwc.shape
    P = w1.shape[1]
    Cout = w3.shape[1]
    assert Cout == Cin, "identity residual requires inplanes == planes*4"

    # Lane-dense bottleneck width (pad P up to a multiple of 128; exact math:
    # padded channels are zero through conv1/bn1/relu and multiply zero w2/w3).
    Pp = ((P + 127) // 128) * 128

    # Fold BN scales into the conv weights (f32, BEFORE the bf16 cast).
    w1f = w1 * s1.reshape(1, P)
    w2f = w2 * s2.reshape(1, 1, 1, P)
    w3f = w3 * s3.reshape(1, Cout)

    def pad_last(a, to):
        return jnp.pad(a, [(0, 0)] * (a.ndim - 1) + [(0, to - a.shape[-1])])

    w1b = pad_last(w1f, Pp).astype(jnp.bfloat16)                          # (Cin, Pp)
    w2b = jnp.pad(w2f, ((0, 0), (0, 0), (0, Pp - P), (0, Pp - P))
                  ).astype(jnp.bfloat16)                                  # (3,3,Pp,Pp)
    w3b = jnp.pad(w3f, ((0, Pp - P), (0, 0))).astype(jnp.bfloat16)        # (Pp, Cout)
    b1p = pad_last(b1.reshape(1, P), Pp)
    b2p = pad_last(b2.reshape(1, P), Pp)
    b3r = b3.reshape(1, Cout)

    # Row tile over H: bound the conv2 f32 accumulator (TH*W*Pp*4) to ~1 MiB
    # while keeping TH a divisor of H (x stays a resident full image block).
    if tile_h is None:
        acc_budget = 1 << 20
        max_rows = max(1, acc_budget // (W * Pp * 4))
        divisors = [d for d in range(1, H + 1) if H % d == 0]
        ok = [d for d in divisors if (d == H or d + 2 <= H)]
        fits = [d for d in ok if d <= max_rows]
        tile_h = max(fits) if fits else min(ok)
    TH = tile_h
    assert H % TH == 0, "tile_h must divide H"
    assert TH == H or TH + 2 <= H, "halo'd slab must fit inside the image"
    grid = (N, H // TH)

    # Sublane-pad the scratch width (W+2 -> multiple of 8).
    Wp = max(8, ((W + 2 + 7) // 8) * 8)

    itemsize = x_nhwc.dtype.itemsize
    flops = 2 * N * H * W * (Cin * Pp + 9 * Pp * Pp + Pp * Cout)
    bytes_accessed = int(
        x_nhwc.size * itemsize + N * H * W * Cout * itemsize
        + (w1b.size + w2b.size + w3b.size) * 2
        + (b1p.size + b2p.size + b3r.size) * 4)

    # Generation-aware VMEM limit: real requirement + headroom, capped at 3/4
    # of this chip's VMEM capacity (v7x has only 64 MiB per TC).
    needed = (2 * H * W * Cin * itemsize                  # x, double-buffered
              + 2 * (w1b.size + w2b.size + w3b.size)      # bf16 weights
              + (TH + 2) * Wp * Pp * 2                    # conv1 scratch (bf16)
              + 2 * TH * W * Cout * itemsize              # out tile, double-buffered
              + 4 * (b1p.size + b2p.size + b3r.size))
    try:
        vmem_cap = int(pltpu.get_tpu_info().vmem_capacity_bytes)
    except Exception:
        vmem_cap = 64 * 1024 * 1024
    vmem_limit = int(min(vmem_cap * 3 // 4, max(2 * needed, 32 * 1024 * 1024)))

    const2 = lambda n, j: (0, 0)
    grid_spec = pltpu.PrefetchScalarGridSpec(
        num_scalar_prefetch=0,
        grid=grid,
        in_specs=[
            # x: one full image per batch element, resident across the H tiles
            pl.BlockSpec((None, H, W, Cin), lambda n, j: (n, 0, 0, 0)),
            # weights / BN biases: constant block index -> VMEM resident
            pl.BlockSpec((Cin, Pp), const2),
            pl.BlockSpec((3, 3, Pp, Pp), lambda n, j: (0, 0, 0, 0)),
            pl.BlockSpec((Pp, Cout), const2),
            pl.BlockSpec((1, Pp), const2),
            pl.BlockSpec((1, Pp), const2),
            pl.BlockSpec((1, Cout), const2),
        ],
        out_specs=pl.BlockSpec((None, TH, W, Cout), lambda n, j: (n, j, 0, 0)),
        scratch_shapes=[pltpu.VMEM((TH + 2, Wp, Pp), jnp.bfloat16)],
    )

    return pl.pallas_call(
        bottleneck_kernel,
        out_shape=jax.ShapeDtypeStruct((N, H, W, Cout), x_nhwc.dtype),
        grid_spec=grid_spec,
        compiler_params=pltpu.CompilerParams(
            dimension_semantics=("parallel", "parallel"),
            vmem_limit_bytes=vmem_limit,
        ),
        cost_estimate=pl.CostEstimate(
            flops=flops, transcendentals=0, bytes_accessed=bytes_accessed),
    )(x_nhwc, w1b, w2b, w3b, b1p, b2p, b3r)


def fold_bn(gamma, beta, mean, var, eps=1e-5):
    scale = gamma / jnp.sqrt(var + eps)
    bias = beta - mean * scale
    return scale.reshape(1, -1), bias.reshape(1, -1)


def bottleneck_reference(x_nhwc, params):
    """Pure-JAX reference matching the kernel's precision recipe
    (BN scale folded into bf16 weights, f32 accumulation, f32 bias/ReLU/residual)."""
    w1, w2, w3, s1, b1, s2, b2, s3, b3 = params
    P = w1.shape[1]
    w1f = (w1 * s1.reshape(1, -1)).astype(jnp.bfloat16)
    w2f = (w2 * s2.reshape(1, 1, 1, -1)).astype(jnp.bfloat16)
    w3f = (w3 * s3.reshape(1, -1)).astype(jnp.bfloat16)
    dn = lax.conv_dimension_numbers(x_nhwc.shape, (1, 1, 1, 1),
                                    ("NHWC", "HWIO", "NHWC"))

    def conv(h, w_hwio, padding):
        return lax.conv_general_dilated(
            h.astype(jnp.bfloat16), w_hwio, (1, 1), padding,
            dimension_numbers=dn, preferred_element_type=jnp.float32)

    h = conv(x_nhwc, w1f.reshape(1, 1, -1, P), "VALID") + b1.reshape(1, 1, 1, -1)
    h = jnp.maximum(h, 0.0)
    h = conv(h, w2f, ((1, 1), (1, 1))) + b2.reshape(1, 1, 1, -1)
    h = jnp.maximum(h, 0.0)
    h = conv(h, w3f.reshape(1, 1, P, -1), "VALID") + b3.reshape(1, 1, 1, -1)
    return jnp.maximum(h + x_nhwc, 0.0)


if __name__ == "__main__":
    # inplanes = planes * expansion so the identity residual is valid
    # (downsample=None, stride=1, dilate=1).
    N, H, W = 2, 16, 16
    planes = 32
    inplanes = planes * 4        # 128

    key = jax.random.PRNGKey(0)
    ks = jax.random.split(key, 8)

    x = jax.random.normal(ks[0], (N, H, W, inplanes), jnp.float32)
    w1 = jax.random.normal(ks[1], (inplanes, planes), jnp.float32) * 0.05
    w2 = jax.random.normal(ks[2], (3, 3, planes, planes), jnp.float32) * 0.05
    w3 = jax.random.normal(ks[3], (planes, planes * 4), jnp.float32) * 0.05

    def bn_params(k, c):
        k1, k2, k3 = jax.random.split(k, 3)
        gamma = 1.0 + 0.1 * jax.random.normal(k1, (c,), jnp.float32)
        beta = 0.1 * jax.random.normal(k2, (c,), jnp.float32)
        mean = 0.1 * jax.random.normal(k3, (c,), jnp.float32)
        var = jnp.ones((c,), jnp.float32)
        return fold_bn(gamma, beta, mean, var)

    s1, b1 = bn_params(ks[4], planes)
    s2, b2 = bn_params(ks[5], planes)
    s3, b3 = bn_params(ks[6], planes * 4)
    params = (w1, w2, w3, s1, b1, s2, b2, s3, b3)

    ref = jax.block_until_ready(bottleneck_reference(x, params))

    # tile_h=4 -> grid (2, 4): exercises top, interior and bottom halo paths.
    out_a = jax.block_until_ready(bottleneck_pallas(x, params, tile_h=4))
    # auto tile_h (whole image per tile here) -> exercises the nj==1 path.
    out_b = jax.block_until_ready(bottleneck_pallas(x, params))

    assert out_a.shape == out_b.shape == ref.shape == (N, H, W, inplanes)
    err_a = jnp.max(jnp.abs(out_a - ref))
    err_b = jnp.max(jnp.abs(out_b - ref))
    assert jnp.allclose(out_a, ref, atol=5e-3, rtol=5e-3), \
        f"mismatch (tiled) vs JAX reference, max abs err = {err_a}"
    assert jnp.allclose(out_b, ref, atol=5e-3, rtol=5e-3), \
        f"mismatch (single tile) vs JAX reference, max abs err = {err_b}"

    print("KERNEL_OK")
</pallas_src>

<mosaic_0001>
module attributes {stable_mosaic.version = 11 : i64} {
  func.func @bottleneck_kernel(%arg0: i32, %arg1: i32, %arg2: memref<1x16x16x128xf32, #tpu.memory_space<vmem>>, %arg3: memref<128x128xbf16, #tpu.memory_space<vmem>>, %arg4: memref<3x3x128x128xbf16, #tpu.memory_space<vmem>>, %arg5: memref<128x128xbf16, #tpu.memory_space<vmem>>, %arg6: memref<1x128xf32, #tpu.memory_space<vmem>>, %arg7: memref<1x128xf32, #tpu.memory_space<vmem>>, %arg8: memref<1x128xf32, #tpu.memory_space<vmem>>, %arg9: memref<1x4x16x128xf32, #tpu.memory_space<vmem>>, %arg10: memref<6x24x128xbf16, #tpu.memory_space<vmem>>) attributes {dimension_semantics = [#tpu.dimension_semantics<parallel>, #tpu.dimension_semantics<parallel>], iteration_bounds = array<i64: 2, 4>, scalar_prefetch = 0 : i64, scratch_operands = 1 : i64, tpu.core_type = #tpu.core_type<tc>, window_params = [{transform_indices = @transform_0, window_bounds = array<i64: 1, 16, 16, 128>}, {pipeline_mode = #tpu.pipeline_mode<synchronous>, transform_indices = @transform_1, window_bounds = array<i64: 128, 128>}, {pipeline_mode = #tpu.pipeline_mode<synchronous>, transform_indices = @transform_2, window_bounds = array<i64: 3, 3, 128, 128>}, {pipeline_mode = #tpu.pipeline_mode<synchronous>, transform_indices = @transform_3, window_bounds = array<i64: 128, 128>}, {pipeline_mode = #tpu.pipeline_mode<synchronous>, transform_indices = @transform_4, window_bounds = array<i64: 1, 128>}, {pipeline_mode = #tpu.pipeline_mode<synchronous>, transform_indices = @transform_5, window_bounds = array<i64: 1, 128>}, {pipeline_mode = #tpu.pipeline_mode<synchronous>, transform_indices = @transform_6, window_bounds = array<i64: 1, 128>}, {transform_indices = @transform_7, window_bounds = array<i64: 1, 4, 16, 128>}]} {
    %c4_i32 = arith.constant 4 : i32
    %0 = arith.muli %arg1, %c4_i32 : i32
    %1 = tpu.assume_multiple %0, 4 : i32
    %cst = arith.constant 0.000000e+00 : bf16
    %2 = vector.broadcast %cst : bf16 to vector<6x1x128xbf16>
    %c0 = arith.constant 0 : index
    %c0_0 = arith.constant 0 : index
    %c0_1 = arith.constant 0 : index
    %3 = vector.load %arg10[%c0, %c0_0, %c0_1] : memref<6x24x128xbf16, #tpu.memory_space<vmem>>, vector<6x1x128xbf16>
    tpu.vector_store %arg10[%c0, %c0_0, %c0_1], %2 {strides = array<i32>} : memref<6x24x128xbf16, #tpu.memory_space<vmem>>, vector<6x1x128xbf16>,
    %c0_2 = arith.constant 0 : index
    %c17 = arith.constant 17 : index
    %c0_3 = arith.constant 0 : index
    %4 = vector.load %arg10[%c0_2, %c17, %c0_3] : memref<6x24x128xbf16, #tpu.memory_space<vmem>>, vector<6x1x128xbf16>
    tpu.vector_store %arg10[%c0_2, %c17, %c0_3], %2 {strides = array<i32>} : memref<6x24x128xbf16, #tpu.memory_space<vmem>>, vector<6x1x128xbf16>,
    %cst_4 = arith.constant 0.000000e+00 : bf16
    %5 = vector.broadcast %cst_4 : bf16 to vector<1x16x128xbf16>
    %c0_5 = arith.constant 0 : index
    %c0_6 = arith.constant 0 : index
    %6 = vector.load %arg3[%c0_5, %c0_6] : memref<128x128xbf16, #tpu.memory_space<vmem>>, vector<128x128xbf16>
    %c0_7 = arith.constant 0 : index
    %c0_8 = arith.constant 0 : index
    %7 = vector.load %arg6[%c0_7, %c0_8] : memref<1x128xf32, #tpu.memory_space<vmem>>, vector<1x128xf32>
    %c1_i32 = arith.constant 1 : i32
    %8 = arith.subi %1, %c1_i32 : i32
    %c0_i32 = arith.constant 0 : i32
    %9 = arith.maxsi %8, %c0_i32 : i32
    %c10_i32 = arith.constant 10 : i32
    %10 = arith.minsi %9, %c10_i32 : i32
    %c0_9 = arith.constant 0 : index
    %11 = arith.index_cast %10 : i32 to index
    %c0_10 = arith.constant 0 : index
    %c0_11 = arith.constant 0 : index
    %12 = vector.load %arg2[%c0_9, %11, %c0_10, %c0_11] : memref<1x16x16x128xf32, #tpu.memory_space<vmem>>, vector<1x6x16x128xf32>
    %13 = vector.shape_cast %12 : vector<1x6x16x128xf32> to vector<6x16x128xf32>
    %14 = vector.shape_cast %13 : vector<6x16x128xf32> to vector<96x128xf32>
    %15 = arith.truncf %14 : vector<96x128xf32> to vector<96x128xbf16>
    %cst_12 = arith.constant dense<0.000000e+00> : vector<96x128xf32>
    %16 = tpu.matmul %15, %6, %cst_12 {dimension_numbers = #tpu.dot_dimension_numbers<[1], [0], [0], [1], [0, 0, 1, 1], [], []>} : vector<96x128xbf16>, vector<128x128xbf16>, vector<96x128xf32> -> vector<96x128xf32>
    %17 = vector.broadcast %7 : vector<1x128xf32> to vector<96x128xf32>
    %18 = arith.addf %16, %17 : vector<96x128xf32>
    %cst_13 = arith.constant 0.000000e+00 : f32
    %19 = vector.broadcast %cst_13 : f32 to vector<96x128xf32>
    %20 = arith.maximumf %18, %19 : vector<96x128xf32>
    %21 = arith.truncf %20 : vector<96x128xf32> to vector<96x128xbf16>
    %22 = vector.shape_cast %21 : vector<96x128xbf16> to vector<6x16x128xbf16>
    %c0_i32_14 = arith.constant 0 : i32
    %23 = arith.cmpi eq, %arg1, %c0_i32_14 : i32
    %c3_i32 = arith.constant 3 : i32
    %24 = arith.cmpi eq, %arg1, %c3_i32 : i32
    %c0_i32_15 = arith.constant 0 : i32
    %25 = arith.cmpi sgt, %arg1, %c0_i32_15 : i32
    %c3_i32_16 = arith.constant 3 : i32
    %26 = arith.cmpi slt, %arg1, %c3_i32_16 : i32
    %27 = arith.andi %25, %26 : i1
    %28 = arith.extui %27 : i1 to i32
    %c0_i32_17 = arith.constant 0 : i32
    %29 = arith.cmpi ne, %28, %c0_i32_17 : i32
    scf.if %29 {
      %c0_106 = arith.constant 0 : index
      %c1_107 = arith.constant 1 : index
      %c0_108 = arith.constant 0 : index
      %109 = vector.load %arg10[%c0_106, %c1_107, %c0_108] : memref<6x24x128xbf16, #tpu.memory_space<vmem>>, vector<6x16x128xbf16>
      tpu.vector_store %arg10[%c0_106, %c1_107, %c0_108], %22 {strides = array<i32>} : memref<6x24x128xbf16, #tpu.memory_space<vmem>>, vector<6x16x128xbf16>,
    } else {
    }
    %30 = arith.extui %23 : i1 to i32
    %c0_i32_18 = arith.constant 0 : i32
    %31 = arith.cmpi ne, %30, %c0_i32_18 : i32
    scf.if %31 {
      %109 = vector.extract_strided_slice %22 {offsets = [0, 0, 0], sizes = [5, 16, 128], strides = [1, 1, 1]} : vector<6x16x128xbf16> to vector<5x16x128xbf16>
      %c1_106 = arith.constant 1 : index
      %c1_107 = arith.constant 1 : index
      %c0_108 = arith.constant 0 : index
      %110 = vector.load %arg10[%c1_106, %c1_107, %c0_108] : memref<6x24x128xbf16, #tpu.memory_space<vmem>>, vector<5x16x128xbf16>
      tpu.vector_store %arg10[%c1_106, %c1_107, %c0_108], %109 {strides = array<i32>} : memref<6x24x128xbf16, #tpu.memory_space<vmem>>, vector<5x16x128xbf16>,
      %c0_109 = arith.constant 0 : index
      %c1_110 = arith.constant 1 : index
      %c0_111 = arith.constant 0 : index
      %111 = vector.load %arg10[%c0_109, %c1_110, %c0_111] : memref<6x24x128xbf16, #tpu.memory_space<vmem>>, vector<1x16x128xbf16>
      tpu.vector_store %arg10[%c0_109, %c1_110, %c0_111], %5 {strides = array<i32>} : memref<6x24x128xbf16, #tpu.memory_space<vmem>>, vector<1x16x128xbf16>,
    } else {
    }
    %32 = arith.extui %24 : i1 to i32
    %c0_i32_19 = arith.constant 0 : i32
    %33 = arith.cmpi ne, %32, %c0_i32_19 : i32
    scf.if %33 {
      %109 = vector.extract_strided_slice %22 {offsets = [1, 0, 0], sizes = [5, 16, 128], strides = [1, 1, 1]} : vector<6x16x128xbf16> to vector<5x16x128xbf16>
      %c0_106 = arith.constant 0 : index
      %c1_107 = arith.constant 1 : index
      %c0_108 = arith.constant 0 : index
      %110 = vector.load %arg10[%c0_106, %c1_107, %c0_108] : memref<6x24x128xbf16, #tpu.memory_space<vmem>>, vector<5x16x128xbf16>
      tpu.vector_store %arg10[%c0_106, %c1_107, %c0_108], %109 {strides = array<i32>} : memref<6x24x128xbf16, #tpu.memory_space<vmem>>, vector<5x16x128xbf16>,
      %c5 = arith.constant 5 : index
      %c1_109 = arith.constant 1 : index
      %c0_110 = arith.constant 0 : index
      %111 = vector.load %arg10[%c5, %c1_109, %c0_110] : memref<6x24x128xbf16, #tpu.memory_space<vmem>>, vector<1x16x128xbf16>
      tpu.vector_store %arg10[%c5, %c1_109, %c0_110], %5 {strides = array<i32>} : memref<6x24x128xbf16, #tpu.memory_space<vmem>>, vector<1x16x128xbf16>,
    } else {
    }
    %c0_20 = arith.constant 0 : index
    %c0_21 = arith.constant 0 : index
    %c0_22 = arith.constant 0 : index
    %34 = vector.load %arg10[%c0_20, %c0_21, %c0_22] : memref<6x24x128xbf16, #tpu.memory_space<vmem>>, vector<4x16x128xbf16>
    %35 = vector.shape_cast %34 : vector<4x16x128xbf16> to vector<64x128xbf16>
    %c0_23 = arith.constant 0 : index
    %c0_24 = arith.constant 0 : index
    %c0_25 = arith.constant 0 : index
    %c0_26 = arith.constant 0 : index
    %36 = vector.load %arg4[%c0_23, %c0_24, %c0_25, %c0_26] : memref<3x3x128x128xbf16, #tpu.memory_space<vmem>>, vector<1x1x128x128xbf16>
    %37 = vector.shape_cast %36 : vector<1x1x128x128xbf16> to vector<128x128xbf16>
    %cst_27 = arith.constant dense<0.000000e+00> : vector<64x128xf32>
    %38 = tpu.matmul %35, %37, %cst_27 {dimension_numbers = #tpu.dot_dimension_numbers<[1], [0], [0], [1], [0, 0, 1, 1], [], []>} : vector<64x128xbf16>, vector<128x128xbf16>, vector<64x128xf32> -> vector<64x128xf32>
    %c0_28 = arith.constant 0 : index
    %c1 = arith.constant 1 : index
    %c0_29 = arith.constant 0 : index
    %39 = vector.load %arg10[%c0_28, %c1, %c0_29] : memref<6x24x128xbf16, #tpu.memory_space<vmem>>, vector<4x16x128xbf16>
    %40 = vector.shape_cast %39 : vector<4x16x128xbf16> to vector<64x128xbf16>
    %c0_30 = arith.constant 0 : index
    %c1_31 = arith.constant 1 : index
    %c0_32 = arith.constant 0 : index
    %c0_33 = arith.constant 0 : index
    %41 = vector.load %arg4[%c0_30, %c1_31, %c0_32, %c0_33] : memref<3x3x128x128xbf16, #tpu.memory_space<vmem>>, vector<1x1x128x128xbf16>
    %42 = vector.shape_cast %41 : vector<1x1x128x128xbf16> to vector<128x128xbf16>
    %cst_34 = arith.constant dense<0.000000e+00> : vector<64x128xf32>
    %43 = tpu.matmul %40, %42, %cst_34 {dimension_numbers = #tpu.dot_dimension_numbers<[1], [0], [0], [1], [0, 0, 1, 1], [], []>} : vector<64x128xbf16>, vector<128x128xbf16>, vector<64x128xf32> -> vector<64x128xf32>
    %44 = arith.addf %38, %43 : vector<64x128xf32>
    %c0_35 = arith.constant 0 : index
    %c2 = arith.constant 2 : index
    %c0_36 = arith.constant 0 : index
    %45 = vector.load %arg10[%c0_35, %c2, %c0_36] : memref<6x24x128xbf16, #tpu.memory_space<vmem>>, vector<4x16x128xbf16>
    %46 = vector.shape_cast %45 : vector<4x16x128xbf16> to vector<64x128xbf16>
    %c0_37 = arith.constant 0 : index
    %c2_38 = arith.constant 2 : index
    %c0_39 = arith.constant 0 : index
    %c0_40 = arith.constant 0 : index
    %47 = vector.load %arg4[%c0_37, %c2_38, %c0_39, %c0_40] : memref<3x3x128x128xbf16, #tpu.memory_space<vmem>>, vector<1x1x128x128xbf16>
    %48 = vector.shape_cast %47 : vector<1x1x128x128xbf16> to vector<128x128xbf16>
    %cst_41 = arith.constant dense<0.000000e+00> : vector<64x128xf32>
    %49 = tpu.matmul %46, %48, %cst_41 {dimension_numbers = #tpu.dot_dimension_numbers<[1], [0], [0], [1], [0, 0, 1, 1], [], []>} : vector<64x128xbf16>, vector<128x128xbf16>, vector<64x128xf32> -> vector<64x128xf32>
    %50 = arith.addf %44, %49 : vector<64x128xf32>
    %c1_42 = arith.constant 1 : index
    %c0_43 = arith.constant 0 : index
    %c0_44 = arith.constant 0 : index
    %51 = vector.load %arg10[%c1_42, %c0_43, %c0_44] : memref<6x24x128xbf16, #tpu.memory_space<vmem>>, vector<4x16x128xbf16>
    %52 = vector.shape_cast %51 : vector<4x16x128xbf16> to vector<64x128xbf16>
    %c1_45 = arith.constant 1 : index
    %c0_46 = arith.constant 0 : index
    %c0_47 = arith.constant 0 : index
    %c0_48 = arith.constant 0 : index
    %53 = vector.load %arg4[%c1_45, %c0_46, %c0_47, %c0_48] : memref<3x3x128x128xbf16, #tpu.memory_space<vmem>>, vector<1x1x128x128xbf16>
    %54 = vector.shape_cast %53 : vector<1x1x128x128xbf16> to vector<128x128xbf16>
    %cst_49 = arith.constant dense<0.000000e+00> : vector<64x128xf32>
    %55 = tpu.matmul %52, %54, %cst_49 {dimension_numbers = #tpu.dot_dimension_numbers<[1], [0], [0], [1], [0, 0, 1, 1], [], []>} : vector<64x128xbf16>, vector<128x128xbf16>, vector<64x128xf32> -> vector<64x128xf32>
    %56 = arith.addf %50, %55 : vector<64x128xf32>
    %c1_50 = arith.constant 1 : index
    %c1_51 = arith.constant 1 : index
    %c0_52 = arith.constant 0 : index
    %57 = vector.load %arg10[%c1_50, %c1_51, %c0_52] : memref<6x24x128xbf16, #tpu.memory_space<vmem>>, vector<4x16x128xbf16>
    %58 = vector.shape_cast %57 : vector<4x16x128xbf16> to vector<64x128xbf16>
    %c1_53 = arith.constant 1 : index
    %c1_54 = arith.constant 1 : index
    %c0_55 = arith.constant 0 : index
    %c0_56 = arith.constant 0 : index
    %59 = vector.load %arg4[%c1_53, %c1_54, %c0_55, %c0_56] : memref<3x3x128x128xbf16, #tpu.memory_space<vmem>>, vector<1x1x128x128xbf16>
    %60 = vector.shape_cast %59 : vector<1x1x128x128xbf16> to vector<128x128xbf16>
    %cst_57 = arith.constant dense<0.000000e+00> : vector<64x128xf32>
    %61 = tpu.matmul %58, %60, %cst_57 {dimension_numbers = #tpu.dot_dimension_numbers<[1], [0], [0], [1], [0, 0, 1, 1], [], []>} : vector<64x128xbf16>, vector<128x128xbf16>, vector<64x128xf32> -> vector<64x128xf32>
    %62 = arith.addf %56, %61 : vector<64x128xf32>
    %c1_58 = arith.constant 1 : index
    %c2_59 = arith.constant 2 : index
    %c0_60 = arith.constant 0 : index
    %63 = vector.load %arg10[%c1_58, %c2_59, %c0_60] : memref<6x24x128xbf16, #tpu.memory_space<vmem>>, vector<4x16x128xbf16>
    %64 = vector.shape_cast %63 : vector<4x16x128xbf16> to vector<64x128xbf16>
    %c1_61 = arith.constant 1 : index
    %c2_62 = arith.constant 2 : index
    %c0_63 = arith.constant 0 : index
    %c0_64 = arith.constant 0 : index
    %65 = vector.load %arg4[%c1_61, %c2_62, %c0_63, %c0_64] : memref<3x3x128x128xbf16, #tpu.memory_space<vmem>>, vector<1x1x128x128xbf16>
    %66 = vector.shape_cast %65 : vector<1x1x128x128xbf16> to vector<128x128xbf16>
    %cst_65 = arith.constant dense<0.000000e+00> : vector<64x128xf32>
    %67 = tpu.matmul %64, %66, %cst_65 {dimension_numbers = #tpu.dot_dimension_numbers<[1], [0], [0], [1], [0, 0, 1, 1], [], []>} : vector<64x128xbf16>, vector<128x128xbf16>, vector<64x128xf32> -> vector<64x128xf32>
    %68 = arith.addf %62, %67 : vector<64x128xf32>
    %c2_66 = arith.constant 2 : index
    %c0_67 = arith.constant 0 : index
    %c0_68 = arith.constant 0 : index
    %69 = vector.load %arg10[%c2_66, %c0_67, %c0_68] : memref<6x24x128xbf16, #tpu.memory_space<vmem>>, vector<4x16x128xbf16>
    %70 = vector.shape_cast %69 : vector<4x16x128xbf16> to vector<64x128xbf16>
    %c2_69 = arith.constant 2 : index
    %c0_70 = arith.constant 0 : index
    %c0_71 = arith.constant 0 : index
    %c0_72 = arith.constant 0 : index
    %71 = vector.load %arg4[%c2_69, %c0_70, %c0_71, %c0_72] : memref<3x3x128x128xbf16, #tpu.memory_space<vmem>>, vector<1x1x128x128xbf16>
    %72 = vector.shape_cast %71 : vector<1x1x128x128xbf16> to vector<128x128xbf16>
    %cst_73 = arith.constant dense<0.000000e+00> : vector<64x128xf32>
    %73 = tpu.matmul %70, %72, %cst_73 {dimension_numbers = #tpu.dot_dimension_numbers<[1], [0], [0], [1], [0, 0, 1, 1], [], []>} : vector<64x128xbf16>, vector<128x128xbf16>, vector<64x128xf32> -> vector<64x128xf32>
    %74 = arith.addf %68, %73 : vector<64x128xf32>
    %c2_74 = arith.constant 2 : index
    %c1_75 = arith.constant 1 : index
    %c0_76 = arith.constant 0 : index
    %75 = vector.load %arg10[%c2_74, %c1_75, %c0_76] : memref<6x24x128xbf16, #tpu.memory_space<vmem>>, vector<4x16x128xbf16>
    %76 = vector.shape_cast %75 : vector<4x16x128xbf16> to vector<64x128xbf16>
    %c2_77 = arith.constant 2 : index
    %c1_78 = arith.constant 1 : index
    %c0_79 = arith.constant 0 : index
    %c0_80 = arith.constant 0 : index
    %77 = vector.load %arg4[%c2_77, %c1_78, %c0_79, %c0_80] : memref<3x3x128x128xbf16, #tpu.memory_space<vmem>>, vector<1x1x128x128xbf16>
    %78 = vector.shape_cast %77 : vector<1x1x128x128xbf16> to vector<128x128xbf16>
    %cst_81 = arith.constant dense<0.000000e+00> : vector<64x128xf32>
    %79 = tpu.matmul %76, %78, %cst_81 {dimension_numbers = #tpu.dot_dimension_numbers<[1], [0], [0], [1], [0, 0, 1, 1], [], []>} : vector<64x128xbf16>, vector<128x128xbf16>, vector<64x128xf32> -> vector<64x128xf32>
    %80 = arith.addf %74, %79 : vector<64x128xf32>
    %c2_82 = arith.constant 2 : index
    %c2_83 = arith.constant 2 : index
    %c0_84 = arith.constant 0 : index
    %81 = vector.load %arg10[%c2_82, %c2_83, %c0_84] : memref<6x24x128xbf16, #tpu.memory_space<vmem>>, vector<4x16x128xbf16>
    %82 = vector.shape_cast %81 : vector<4x16x128xbf16> to vector<64x128xbf16>
    %c2_85 = arith.constant 2 : index
    %c2_86 = arith.constant 2 : index
    %c0_87 = arith.constant 0 : index
    %c0_88 = arith.constant 0 : index
    %83 = vector.load %arg4[%c2_85, %c2_86, %c0_87, %c0_88] : memref<3x3x128x128xbf16, #tpu.memory_space<vmem>>, vector<1x1x128x128xbf16>
    %84 = vector.shape_cast %83 : vector<1x1x128x128xbf16> to vector<128x128xbf16>
    %cst_89 = arith.constant dense<0.000000e+00> : vector<64x128xf32>
    %85 = tpu.matmul %82, %84, %cst_89 {dimension_numbers = #tpu.dot_dimension_numbers<[1], [0], [0], [1], [0, 0, 1, 1], [], []>} : vector<64x128xbf16>, vector<128x128xbf16>, vector<64x128xf32> -> vector<64x128xf32>
    %86 = arith.addf %80, %85 : vector<64x128xf32>
    %c0_90 = arith.constant 0 : index
    %c0_91 = arith.constant 0 : index
    %87 = vector.load %arg7[%c0_90, %c0_91] : memref<1x128xf32, #tpu.memory_space<vmem>>, vector<1x128xf32>
    %88 = vector.broadcast %87 : vector<1x128xf32> to vector<64x128xf32>
    %89 = arith.addf %86, %88 : vector<64x128xf32>
    %cst_92 = arith.constant 0.000000e+00 : f32
    %90 = vector.broadcast %cst_92 : f32 to vector<64x128xf32>
    %91 = arith.maximumf %89, %90 : vector<64x128xf32>
    %92 = arith.truncf %91 : vector<64x128xf32> to vector<64x128xbf16>
    %c0_93 = arith.constant 0 : index
    %c0_94 = arith.constant 0 : index
    %93 = vector.load %arg5[%c0_93, %c0_94] : memref<128x128xbf16, #tpu.memory_space<vmem>>, vector<128x128xbf16>
    %cst_95 = arith.constant dense<0.000000e+00> : vector<64x128xf32>
    %94 = tpu.matmul %92, %93, %cst_95 {dimension_numbers = #tpu.dot_dimension_numbers<[1], [0], [0], [1], [0, 0, 1, 1], [], []>} : vector<64x128xbf16>, vector<128x128xbf16>, vector<64x128xf32> -> vector<64x128xf32>
    %c0_96 = arith.constant 0 : index
    %c0_97 = arith.constant 0 : index
    %95 = vector.load %arg8[%c0_96, %c0_97] : memref<1x128xf32, #tpu.memory_space<vmem>>, vector<1x128xf32>
    %96 = vector.broadcast %95 : vector<1x128xf32> to vector<64x128xf32>
    %97 = arith.addf %94, %96 : vector<64x128xf32>
    %c0_98 = arith.constant 0 : index
    %98 = arith.index_cast %1 : i32 to index
    %c0_99 = arith.constant 0 : index
    %c0_100 = arith.constant 0 : index
    %99 = vector.load %arg2[%c0_98, %98, %c0_99, %c0_100] : memref<1x16x16x128xf32, #tpu.memory_space<vmem>>, vector<1x4x16x128xf32>
    %100 = vector.shape_cast %99 : vector<1x4x16x128xf32> to vector<4x16x128xf32>
    %101 = vector.shape_cast %100 : vector<4x16x128xf32> to vector<64x128xf32>
    %102 = arith.addf %97, %101 : vector<64x128xf32>
    %cst_101 = arith.constant 0.000000e+00 : f32
    %103 = vector.broadcast %cst_101 : f32 to vector<64x128xf32>
    %104 = arith.maximumf %102, %103 : vector<64x128xf32>
    %105 = vector.shape_cast %104 : vector<64x128xf32> to vector<4x16x128xf32>
    %c0_102 = arith.constant 0 : index
    %c0_103 = arith.constant 0 : index
    %c0_104 = arith.constant 0 : index
    %c0_105 = arith.constant 0 : index
    %106 = vector.load %arg9[%c0_102, %c0_103, %c0_104, %c0_105] : memref<1x4x16x128xf32, #tpu.memory_space<vmem>>, vector<1x4x16x128xf32>
    %107 = vector.shape_cast %106 : vector<1x4x16x128xf32> to vector<4x16x128xf32>
    %108 = vector.shape_cast %105 : vector<4x16x128xf32> to vector<1x4x16x128xf32>
    tpu.vector_store %arg9[%c0_102, %c0_103, %c0_104, %c0_105], %108 {strides = array<i32>} : memref<1x4x16x128xf32, #tpu.memory_space<vmem>>, vector<1x4x16x128xf32>,
    return
  }
  func.func @transform_0(%arg0: i32, %arg1: i32) -> (i32, i32, i32, i32) {
    %c0_i32 = arith.constant 0 : i32
    %c0_i32_0 = arith.constant 0 : i32
    %c0_i32_1 = arith.constant 0 : i32
    %c0_i32_2 = arith.constant 0 : i32
    return %arg0, %c0_i32, %c0_i32_0, %c0_i32_1 : i32, i32, i32, i32
  }
  func.func @transform_1(%arg0: i32, %arg1: i32) -> (i32, i32) {
    %c0_i32 = arith.constant 0 : i32
    %c0_i32_0 = arith.constant 0 : i32
    %c0_i32_1 = arith.constant 0 : i32
    return %c0_i32, %c0_i32_0 : i32, i32
  }
  func.func @transform_2(%arg0: i32, %arg1: i32) -> (i32, i32, i32, i32) {
    %c0_i32 = arith.constant 0 : i32
    %c0_i32_0 = arith.constant 0 : i32
    %c0_i32_1 = arith.constant 0 : i32
    %c0_i32_2 = arith.constant 0 : i32
    %c0_i32_3 = arith.constant 0 : i32
    return %c0_i32, %c0_i32_0, %c0_i32_1, %c0_i32_2 : i32, i32, i32, i32
  }
  func.func @transform_3(%arg0: i32, %arg1: i32) -> (i32, i32) {
    %c0_i32 = arith.constant 0 : i32
    %c0_i32_0 = arith.constant 0 : i32
    %c0_i32_1 = arith.constant 0 : i32
    return %c0_i32, %c0_i32_0 : i32, i32
  }
  func.func @transform_4(%arg0: i32, %arg1: i32) -> (i32, i32) {
    %c0_i32 = arith.constant 0 : i32
    %c0_i32_0 = arith.constant 0 : i32
    %c0_i32_1 = arith.constant 0 : i32
    return %c0_i32, %c0_i32_0 : i32, i32
  }
  func.func @transform_5(%arg0: i32, %arg1: i32) -> (i32, i32) {
    %c0_i32 = arith.constant 0 : i32
    %c0_i32_0 = arith.constant 0 : i32
    %c0_i32_1 = arith.constant 0 : i32
    return %c0_i32, %c0_i32_0 : i32, i32
  }
  func.func @transform_6(%arg0: i32, %arg1: i32) -> (i32, i32) {
    %c0_i32 = arith.constant 0 : i32
    %c0_i32_0 = arith.constant 0 : i32
    %c0_i32_1 = arith.constant 0 : i32
    return %c0_i32, %c0_i32_0 : i32, i32
  }
  func.func @transform_7(%arg0: i32, %arg1: i32) -> (i32, i32, i32, i32) {
    %c0_i32 = arith.constant 0 : i32
    %c0_i32_0 = arith.constant 0 : i32
    %c0_i32_1 = arith.constant 0 : i32
    return %arg0, %arg1, %c0_i32, %c0_i32_0 : i32, i32, i32, i32
  }
}

</mosaic_0001>

<bundles_post_ra>
// kernel: tpu_custom_call.1
= control target key start
LH: loop header
LB: loop body
LE: loop exit
PB: predicated region body
PF: predicated region fallthrough
CT: control target
= control target key end

     0   :  { %s5537_s0 = inlined_call_operand.hbm [shape: f32[2,16,16,128], index: 0, kind: input, shape index: {}]   ;;  %s5538_s1 = inlined_call_operand.hbm [shape: bf16[128,128], index: 1, kind: input, shape index: {}]   ;;  %s5539_s2 = inlined_call_operand.hbm [shape: bf16[3,3,128,128], index: 2, kind: input, shape index: {}]   ;;  %s5540_s3 = inlined_call_operand.hbm [shape: bf16[128,128], index: 3, kind: input, shape index: {}]   ;;  %s5541_s4 = inlined_call_operand.vmem [shape: f32[1,128], index: 4, kind: input, shape index: {}]   ;;  %s5542_s5 = inlined_call_operand.vmem [shape: f32[1,128], index: 5, kind: input, shape index: {}]   ;;  %s5543_s6 = inlined_call_operand.vmem [shape: f32[1,128], index: 6, kind: input, shape index: {}]   ;;  %s5544_s7 = inlined_call_operand.hbm [shape: f32[2,16,16,128], index: 7, kind: output, shape index: {}]  }
   0x1   :  { %5555 = sst [smem:[#allocation20_spill]] %s5538_s1 }
   0x2   :  { %5556 = sst [smem:[#allocation21_spill]] %s5539_s2 }
   0x3   :  { %5557 = sst [smem:[#allocation22_spill]] %s5541_s4 }
   0x4   :  { %5558 = sst [smem:[#allocation23_spill]] %s5542_s5 }
   0x5   :  { %5559 = sst [smem:[#allocation24_spill]] %s5543_s6 }
   0x6   :  { %5560 = sst [smem:[#allocation25_spill]] %s5544_s7 }
   0x7   :  { %12 = vsyncpa [#allocation4], 0 }
   0x8   :  { %14 = vsyncpa [#allocation4 + $0x1], 0 }
   0x9   :  { %15 = vsyncpa [#allocation7], 0 }
   0xa   :  { %16 = vsyncpa [#allocation10], 0 }
   0xb   :  { %17 = vsyncpa [#allocation5], 0 }
   0xc   :  { %19 = vsyncpa [#allocation5 + $0x1], 0  ;;  %s4599_s24 = smov 0   ;;  %s4601_s25 = smov 0  }
   0xd   :  { %s4603_s26 = smov 0   ;;  %s4605_s27 = smov 0  }
   0xe   :  { %s4607_s28 = smov 0   ;;  %s4609_s29 = smov 0  }
   0xf   :  { %s4611_s30 = smov 0   ;;  %s4613_s8 = smov 0  }
  0x10   :  { %s4615_s9 = smov 0   ;;  %s4617_s10 = smov 0  }
  0x11   :  { %s4619_s11 = smov 0  }
  0x12 LB: > { %5561 = sst [smem:[#allocation16_spill]] %s4504_s24  ;;  %s3351_s12 = sadd.s32 4294967295, %s4544_s11   ;;  %s4544_s11 = sphi %s4619_s11, %s25_s11   ;;  %s4540_s10 = sphi %s4617_s10, %s5620_s10   ;;  %s4536_s9 = sphi %s4615_s9, %s5619_s9   ;;  %s4532_s8 = sphi %s4613_s8, %s5618_s8   ;;  %s4528_s30 = sphi %s4611_s30, %s5617_s30   ;;  %s4524_s29 = sphi %s4609_s29, %s5616_s29   ;;  %s4520_s28 = sphi %s4607_s28, %s5615_s28   ;;  %s4516_s27 = sphi %s4605_s27, %s5614_s27   ;;  %s4512_s26 = sphi %s4603_s26, %s5613_s26   ;;  %s4508_s25 = sphi %s4601_s25, %s5612_s25   ;;  %s4504_s24 = sphi %s4599_s24, %s5611_s24  }
  0x13   : > { %5562 = sst [smem:[#allocation17_spill]] %s4532_s8  ;;  %s3352_s13 = sadd.s32 4294967294, %s4544_s11  }
  0x14   : > { %p57_p0 = scmp.ne.s32.totalorder %s4520_s28, %s4516_s27  ;;  %p4655_p1 = scmp.eq.s32.totalorder %s3351_s12, 0 }
  0x15   : > { %p208_p2 = scmp.ne.s32.totalorder %s4512_s26, %s4508_s25  ;;  %p209_p4 = scmp.eq.s32.totalorder %s3351_s12, 7 }
  0x16   : > { %s5563_s14 = scalar_select %p4655_p1, 1, 0 }
  0x17   : > { %p4664_p3 = por %p4655_p1, %p57_p0  ;;  %p214_p5 = scmp.ne.s32.totalorder %s4508_s25, %s4504_s24 }
  0x18   : > { %p215_p6 = scmp.eq.s32.totalorder %s3352_s13, 7  ;;  %p4670_p7 = por %p209_p4, %p208_p2 }
  0x19   : > { %s5564_s16 = scalar_select %p4664_p3, 1, 0 }
  0x1a   : > { %s5565_s17 = scalar_select %p4670_p7, 1, 0 }
  0x1b   : > { %p3353_p8 = scmp.ge.s32.totalorder %s4544_s11, 1  ;;  %p4675_p9 = por %p215_p6, %p214_p5 }
  0x1c   : > { %5566 = sst [smem:[#allocation18_spill]] %s5565_s17  ;;  %p222_p10 = scmp.lt.s32.totalorder %s4544_s11, 9 }
  0x1d   : > { %s5567_s18 = scalar_select %p4675_p9, 1, 0 }
  0x1e   : > { %p4680_p11 = pnand %p3353_p8, %p222_p10  ;;  %s4546_s20 = smov [#allocation6]  }
  0x1f   : > { %5568 = sst [smem:[#allocation19_spill]] %s5567_s18  ;;  %s234_s21 = sshll.u32 %s4546_s20, 4  ;;  %s4684_s21 = int_to_ptr.vmem [resolvable:$true] %s234_s21 }
  0x20   : > { %s5569_s19 = scalar_select %p4680_p11, 1, 0 }
  0x21   : > { %p4075_p12 = pneg %p4680_p11  ;;  %s4547_s23 = smov [#allocation8]  }
  0x22   : > { %s247_s27 = sshll.u32 %s4547_s23, 4  ;;  %s4548_s12 = smov [#allocation9]   ;;  %s4694_s27 = int_to_ptr.vmem [resolvable:$true] %s247_s27 }
  0x23   : > { %p4690_p13 = pnand %p4075_p12, %p4655_p1  ;;  %s4696_s13 = sshll.u32 %s4548_s12, 4  ;;  %s261_s13 = int_to_ptr.vmem [resolvable:$true] %s4696_s13 }
  0x24   : > { %s5571_s1 = sld [smem:[#allocation20_spill]] }
  0x25   : > { %p4706_p2 = pneg %p4690_p13 }
  0x2a   : > { %s4300_s20 = scalar_lea.hbm %s5571_s1, 1024 }
  0x2b   : > { %p4301_p0 = scmp.ne.s32.totalorder %s5571_s1, %s4300_s20  ;;  %p4307_p6 = scmp.lt.u32.totalorder %s4300_s20, %s5571_s1 }
  0x2d   : > { %p4303_p4 = pnand %p4706_p2, %p4301_p0 }
  0x2f   : > { %p4304_p5 = pneg %p4303_p4 }
  0x31   : > { %p4309_p8 = pnand %p4307_p6, %p4304_p5 }
  0x33   : > { %4312 = shalt.err (!%p4309_p8)
}
  0x34   : > { %s4313_s7 = scalar_lea.vmem %s4684_s21, 1024  ;;  %p4321_p7 = scmp.lt.s32.totalorder %s4684_s21, %s4684_s21 }
  0x35   : > { %p4314_p10 = scmp.ne.s32.totalorder %s4684_s21, %s4313_s7  ;;  %p4322_p1 = scmp.lt.s32.totalorder %s4313_s7, %s4313_s7 }
  0x37   : > { %p4316_p12 = pnand %p4314_p10, %p4706_p2  ;;  %p4323_p0 = por %p4322_p1, %p4321_p7 }
  0x39   : > { %p4317_p9 = pneg %p4316_p12 }
  0x3b   : > { %p4324_p4 = pnand %p4323_p0, %p4317_p9 }
  0x3d   : > { %4327 = shalt.err (!%p4324_p4)
}
  0x3e   : > { %s4549_s24 = smov 64   ;;  %s4550_s15 = smov 4  }
  0x3f   : > { %4078 = dma.hbm_to_vmem [thread:$0]  (!%p4690_p13), %s5571_s1, 1024, %s4684_s21, [#allocation7], %s4549_s24, %s4549_s24, %s4550_s15  }
  0x40   : > { %s5573_s2 = sld [smem:[#allocation21_spill]] }
  0x46   : > { %s4328_s7 = scalar_lea.hbm %s5573_s2, 9216 }
  0x47   : > { %p4329_p1 = scmp.ne.s32.totalorder %s5573_s2, %s4328_s7  ;;  %p4335_p5 = scmp.lt.u32.totalorder %s4328_s7, %s5573_s2 }
  0x49   : > { %p4331_p7 = pnand %p4329_p1, %p4706_p2 }
  0x4b   : > { %p4332_p9 = pneg %p4331_p7 }
  0x4d   : > { %p4337_p6 = pnand %p4335_p5, %p4332_p9 }
  0x4f   : > { %4340 = shalt.err (!%p4337_p6)
}
  0x50   : > { %s4341_s21 = scalar_lea.vmem %s4694_s27, 9216  ;;  %p4349_p0 = scmp.lt.s32.totalorder %s4694_s27, %s4694_s27 }
  0x51   : > { %p4342_p8 = scmp.ne.s32.totalorder %s4694_s27, %s4341_s21  ;;  %p4350_p4 = scmp.lt.s32.totalorder %s4341_s21, %s4341_s21 }
  0x53   : > { %p4344_p10 = pnand %p4342_p8, %p4706_p2  ;;  %p4351_p1 = por %p4350_p4, %p4349_p0 }
  0x55   : > { %p4345_p12 = pneg %p4344_p10 }
  0x57   : > { %p4352_p7 = pnand %p4351_p1, %p4345_p12 }
  0x59   : > { %4355 = shalt.err (!%p4352_p7)
}
  0x5a   : > { %4081 = dma.hbm_to_vmem [thread:$0]  (!%p4690_p13), %s5573_s2, 9216, %s4694_s27, [#allocation7], %s4549_s24, %s4549_s24, %s4550_s15  }
  0x5b   : > { %s4356_s18 = scalar_lea.hbm %s5540_s3, 1024 }
  0x5c   : > { %p4357_p9 = scmp.ne.s32.totalorder %s5540_s3, %s4356_s18  ;;  %p4363_p8 = scmp.lt.u32.totalorder %s4356_s18, %s5540_s3 }
  0x5e   : > { %p4359_p5 = pnand %p4357_p9, %p4706_p2 }
  0x60   : > { %p4360_p6 = pneg %p4359_p5 }
  0x62   : > { %p4365_p10 = pnand %p4363_p8, %p4360_p6 }
  0x64   : > { %4368 = shalt.err (!%p4365_p10)
}
  0x65   : > { %s4369_s21 = scalar_lea.vmem %s261_s13, 1024  ;;  %p4377_p1 = scmp.lt.s32.totalorder %s261_s13, %s261_s13 }
  0x66   : > { %p4370_p12 = scmp.ne.s32.totalorder %s261_s13, %s4369_s21  ;;  %p4378_p7 = scmp.lt.s32.totalorder %s4369_s21, %s4369_s21 }
  0x68   : > { %p4372_p0 = pnand %p4370_p12, %p4706_p2  ;;  %p4379_p3 = por %p4378_p7, %p4377_p1 }
  0x6a   : > { %p4373_p4 = pneg %p4372_p0 }
  0x6c   : > { %p4380_p11 = pnand %p4379_p3, %p4373_p4 }
  0x6e   : > { %4383 = shalt.err (!%p4380_p11)
}
  0x6f   : > { %4084 = dma.hbm_to_vmem [thread:$0]  (!%p4690_p13), %s5540_s3, 1024, %s261_s13, [#allocation10], %s4549_s24, %s4549_s24, %s4550_s15  }
  0x70   : > { %s34_s17 = sadd.s32 1, %s4536_s9  ;;  %s37_s22 = sadd.s32 1, %s4540_s10 }
  0x71   : > { %p35_p3 = scmp.ge.s32.totalorder %s34_s17, 4  ;;  %s44_s5 = sadd.s32 1, %s4524_s29 }
  0x72   : > { %p51_p11 = scmp.ne.s32.totalorder %s4524_s29, %s4520_s28  ;;  %p52_p2 = scmp.eq.s32.totalorder %s4544_s11, 0 }
  0x73   : > { %s5622_s17 = smov (%p35_p3, %s34_s17), 0  ;;  %s5624_s22 = smov (!%p35_p3, %s37_s22), %s4540_s10 }
  0x74   : > { %s194_s6 = ssub.s32 %s4536_s9, %s5622_s17  ;;  %p39_p9 = scmp.ge.s32.totalorder %s5624_s22, 2 }
  0x75   : > { %p4096_p5 = scmp.lt.s32.totalorder %s4544_s11, 8  ;;  %p4790_p13 = por %p52_p2, %p51_p11 }
  0x76   : > { %s283_s24 = sand.u32 1, %s4524_s29   ;;  %s5626_s22 = smov (%p39_p9, %s5624_s22), 0 }
  0x77   : > { %s3358_s15 = sshll.u32 %s283_s24, 8  ;;  %s41_s8 = ssub.s32 %s4540_s10, %s5626_s22 }
  0x78   : > { %p42_p6 = scmp.eq.s32.totalorder %s41_s8, 0  ;;  %s195_s18 = sor.u32 %s194_s6, %s41_s8 }
  0x79   : > { %p196_p8 = scmp.eq.s32.totalorder %s195_s18, 0  ;;  %s3556_s20 = sshll.u32 %s4540_s10, 12 }
  0x7a   : > { %s4801_s23 = scalar_select %p42_p6, %s4524_s29, %s44_s5  }
  0x7b   : > { %s5575_s12 = sadd.s32 1, %s4512_s26  ;;  %s4811_s4 = scalar_lea.hbm %s5537_s0, %s3556_s20 }
  0x7c   : > { %s4806_s7 = scalar_select %p196_p8, %s4512_s26, %s5575_s12  }
  0x7d   : > { %s287_s1 = scalar_lea.vmem [#allocation3], %s3358_s15  ;;  %p4819_p10 = pnand %p4096_p5, %p4790_p13 }
  0x7e   : > { %s294_s2 = sshll.u32 %s287_s1, 4  ;;  %s4823_s6 = scalar_lea.sflag [#allocation4], %s283_s24  ;;  %s4813_s2 = int_to_ptr.vmem [resolvable:$true] %s294_s2 }
  0x7f   : > { %s4384_s8 = scalar_lea.hbm %s4811_s4, 4096  ;;  %p4386_p0 = pneg %p4819_p10 }
  0x80   : > { %p4385_p12 = scmp.ne.s32.totalorder %s4811_s4, %s4384_s8  ;;  %s4389_s13 = scalar_lea.hbm %s5537_s0, 8192 }
  0x81   : > { %p4390_p7 = scmp.lt.u32.totalorder %s4811_s4, %s5537_s0  ;;  %p4391_p3 = scmp.lt.u32.totalorder %s4389_s13, %s4384_s8 }
  0x82   : > { %p4387_p4 = pnand %p4386_p0, %p4385_p12  ;;  %p4393_p2 = scmp.lt.u32.totalorder %s4384_s8, %s4811_s4 }
  0x83   : > { %p4392_p11 = por %p4391_p3, %p4390_p7 }
  0x84   : > { %p4388_p1 = pneg %p4387_p4 }
  0x85   : > { %p4394_p9 = por %p4393_p2, %p4392_p11 }
  0x87   : > { %p4395_p5 = pnand %p4394_p9, %p4388_p1 }
  0x89   : > { %4398 = shalt.err (!%p4395_p5)
}
  0x8a   : > { %s4399_s24 = scalar_lea.vmem %s4813_s2, 4096  ;;  %s4551_s12 = smov [#allocation3]  }
  0x8b   : > { %p4400_p13 = scmp.ne.s32.totalorder %s4813_s2, %s4399_s24  ;;  %s4404_s21 = sshll.u32 %s4551_s12, 4  ;;  %s4405_s21 = int_to_ptr.vmem [resolvable:$false] %s4404_s21 }
  0x8c   : > { %s4406_s27 = scalar_lea.vmem %s4405_s21, 8192  ;;  %p4407_p12 = scmp.lt.s32.totalorder %s4813_s2, %s4405_s21 }
  0x8d   : > { %p4402_p6 = pnand %p4400_p13, %p4386_p0  ;;  %p4408_p4 = scmp.lt.s32.totalorder %s4406_s27, %s4399_s24 }
  0x8f   : > { %p4403_p8 = pneg %p4402_p6  ;;  %p4409_p7 = por %p4408_p4, %p4407_p12 }
  0x91   : > { %p4410_p3 = pnand %p4409_p7, %p4403_p8 }
  0x93   : > { %4413 = shalt.err (!%p4410_p3)
}
  0x94   : > { %s4552_s8 = smov 128   ;;  %s4553_s1 = smov 8  }
  0x95   : > { %4088 = dma.hbm_to_vmem [thread:$0]  (!%p4819_p10), %s4811_s4, 4096, %s4813_s2, %s4823_s6, %s4552_s8, %s4552_s8, %s4553_s1  }
  0x96   : > { %p5577_p0 = scmp.ne.s32.totalorder %s5569_s19, 0 }
  0x97   : > { %s308_s15 = sand.u32 (!%p5577_p0), 1, %s4520_s28   ;;  %p5578_p1 = scmp.ne.s32.totalorder (!%p5577_p0), %s5564_s16, 0 }
  0x98   : > { %306 = sbr.rel (%p5577_p0) target bundleno = 1162 (0x48a), region = 48  ;;  %s4854_s13 = sshll.u32 (!%p5577_p0), %s308_s15, 8 }
  0x99   : > { %s309_s18 = scalar_lea.sflag (!%p5577_p0), [#allocation4], %s308_s15  ;;  %s312_s20 = scalar_lea.vmem (!%p5577_p0), [#allocation3], %s4854_s13 }
  0x9f   : > { %4487 = dma.done.wait (%p5578_p1), %s309_s18, 4096  }
  0xa0   : > { %4489 = vsyncadd (%p5578_p1), %s309_s18, 4294963200  ;;  %p5579_p11 = scmp.ne.s32.totalorder %s5563_s14, 0 }
  0xa2   : > { %4491 = dma.done.wait (%p5579_p11), [#allocation7], 10240  }
  0xa3   : > { %4493 = vsyncadd (%p5579_p11), [#allocation7], 4294957056 }
  0xa4   : > { %4495 = dma.done.wait (%p5579_p11), [#allocation10], 1024  }
  0xa5   : > { %4497 = vsyncadd (%p5579_p11), [#allocation10], 4294966272  ;;  %s352_s2 = sand.u32 1, %s4508_s25   ;;  %s3367_s16 = sshll.u32 %s4528_s30, 2  ;;  %vm358_vm0 = vcmask 1040384   ;;  %v4200_v9 = vld [vmem:[#allocation6] sm:$0xff]  }
  0xa6   : > { %s4872_s19 = sshll.u32 %s352_s2, 6  ;;  %vm359_vm1 = vsmask.f32 256  ;;  %s4875_s4 = sadd.s32 4294967295, %s3367_s16  ;;  %vm379_vm3 = vsmask.f32 7938  ;;  %3727 = vmatprep.subr.bf16.mxu0 %v4200_v9 }
  0xa7   : > { %p417_p10 = scmp.gt.s32.totalorder %s4875_s4, 0  ;;  %vm4880_vm2 = vmand %vm358_vm0, %vm359_vm1  ;;  %p3369_p2 = scmp.lt.s32.totalorder %s4875_s4, 10  ;;  %v361_v1 = vld [vmem:[#allocation2] sm:$0x1]  ;;  %v364_v2 = vld [vmem:[#allocation2 + $0xc] sm:$0x1]  ;;  %3728 = vmatpush3.bf16.msra.mxu0 %v4200_v9 }
  0xa8   : > { %v367_v3 = vld [vmem:[#allocation2 + $0x18] sm:$0x1]  ;;  %v362_v4 = vsel %vm4880_vm2, 0, %v361_v1  ;;  %v365_v5 = vsel %vm4880_vm2, 0, %v364_v2  ;;  %v370_v7 = vld [vmem:[#allocation2 + $0x24] sm:$0x1]  ;;  %vm4896_vm4 = vmand %vm358_vm0, %vm379_vm3 }
  0xa9   : > { %s4886_s14 = scalar_select %p417_p10, %s4875_s4, 0  ;;  %v368_v6 = vsel %vm4880_vm2, 0, %v367_v3  ;;  %363 = vst [vmem:[#allocation2] sm:$0x1] %v362_v4  ;;  %366 = vst [vmem:[#allocation2 + $0xc] sm:$0x1] %v365_v5 }
  0xaa   : > { %369 = vst [vmem:[#allocation2 + $0x18] sm:$0x1] %v368_v6  ;;  %v371_v10 = vsel %vm4880_vm2, 0, %v370_v7  ;;  %v373_v11 = vld [vmem:[#allocation2 + $0x30] sm:$0x1]  ;;  %v4202_v28 = vld [vmem:[#allocation6 + $0x10] sm:$0xff]  }
  0xab   : > { %v376_v12 = vld [vmem:[#allocation2 + $0x3c] sm:$0x1]  ;;  %v4201_v13 = vld [vmem:[#allocation6 + $0x8] sm:$0xff]   ;;  %372 = vst [vmem:[#allocation2 + $0x24] sm:$0x1] %v371_v10  ;;  %v374_v14 = vsel %vm4880_vm2, 0, %v373_v11 }
  0xac   : > { %v377_v15 = vsel %vm4880_vm2, 0, %v376_v12  ;;  %v381_v16 = vld [vmem:[#allocation2 + $0x8] sm:$0x1]  ;;  %v384_v17 = vld [vmem:[#allocation2 + $0x14] sm:$0x1]  ;;  %3729 = vmatprep.subr.bf16.mxu0 %v4201_v13  ;;  %s5628_s14 = smov (!%p3369_p2, %s4886_s14), 10 }
  0xad   : > { %375 = vst [vmem:[#allocation2 + $0x30] sm:$0x1] %v374_v14  ;;  %378 = vst [vmem:[#allocation2 + $0x3c] sm:$0x1] %v377_v15  ;;  %v382_v18 = vsel %vm4896_vm4, 0, %v381_v16  ;;  %v385_v19 = vsel %vm4896_vm4, 0, %v384_v17  ;;  %3730 = vmatpush3.bf16.msra.mxu0 %v4201_v13 }
  0xae   : > { %v387_v20 = vld [vmem:[#allocation2 + $0x20] sm:$0x1]  ;;  %v390_v21 = vld [vmem:[#allocation2 + $0x2c] sm:$0x1]  ;;  %383 = vst [vmem:[#allocation2 + $0x8] sm:$0x1] %v382_v18  ;;  %3731 = vmatprep.subr.bf16.mxu0 %v4202_v28 }
  0xaf   : > { %386 = vst [vmem:[#allocation2 + $0x14] sm:$0x1] %v385_v19  ;;  %v388_v22 = vsel %vm4896_vm4, 0, %v387_v20  ;;  %v391_v23 = vsel %vm4896_vm4, 0, %v390_v21  ;;  %v393_v24 = vld [vmem:[#allocation2 + $0x38] sm:$0x1] }
  0xb0   : > { %v396_v25 = vld [vmem:[#allocation2 + $0x44] sm:$0x1]  ;;  %389 = vst [vmem:[#allocation2 + $0x20] sm:$0x1] %v388_v22  ;;  %392 = vst [vmem:[#allocation2 + $0x2c] sm:$0x1] %v391_v23 }
  0xb1   : > { %v394_v26 = vsel %vm4896_vm4, 0, %v393_v24  ;;  %v397_v27 = vsel %vm4896_vm4, 0, %v396_v25  ;;  %v4203_v29 = vld [vmem:[#allocation6 + $0x18] sm:$0xff]   ;;  %s3374_s5 = sshll.u32 %s5628_s14, 4  ;;  %3732 = vmatpush3.bf16.msra.mxu0 %v4202_v28  ;;  %v4204_v30 = vld [vmem:[#allocation6 + $0x20] sm:$0xff]   ;;  %v4205_v34 = vld [vmem:[#allocation6 + $0x28] sm:$0xff]  }
  0xb2   : > { %395 = vst [vmem:[#allocation2 + $0x38] sm:$0x1] %v394_v26  ;;  %398 = vst [vmem:[#allocation2 + $0x44] sm:$0x1] %v397_v27  ;;  %s4923_s6 = scalar_lea.vmem %s312_s20, %s3374_s5 [#allocation3]  ;;  %3733 = vmatprep.subr.bf16.mxu0 %v4203_v29  ;;  %v4206_v35 = vld [vmem:[#allocation6 + $0x30] sm:$0xff]   ;;  %v4207_v36 = vld [vmem:[#allocation6 + $0x38] sm:$0xff]  }
  0xb3   : > { %v423_v31 = vld [vmem:[%s4923_s6] sm:$0xff]  ;;  %v424_v32 = vld [vmem:[%s4923_s6 + $0x8] sm:$0xff]  ;;  %v425_v37 = vld [vmem:[%s4923_s6 + $0x10] sm:$0xff]  ;;  %p596_p9 = scmp.gt.s32.totalorder %s4528_s30, 0  ;;  %p597_p5 = scmp.lt.s32.totalorder %s4528_s30, 3 }
  0xb4   : > { %v435_v33 = vpack.c.bf16 %v424_v32, %v423_v31  ;;  %v426_v38 = vld [vmem:[%s4923_s6 + $0x18] sm:$0xff]  ;;  %v427_v39 = vld [vmem:[%s4923_s6 + $0x20] sm:$0xff]  ;;  %v428_v40 = vld [vmem:[%s4923_s6 + $0x28] sm:$0xff]  ;;  %s5585_s27 = sld [smem:[#allocation22_spill]]  ;;  %s4971_s8 = scalar_lea.vmem [#allocation11], %s4872_s19 }
  0xb5   : > { %3734 = vmatpush3.bf16.msra.mxu0 %v4203_v29  ;;  %v436_v41 = vpack.c.bf16 %v426_v38, %v425_v37  ;;  %v437_v42 = vpack.c.bf16 %v428_v40, %v427_v39  ;;  %v429_v43 = vld [vmem:[%s4923_s6 + $0x30] sm:$0xff]  ;;  %v430_v44 = vld [vmem:[%s4923_s6 + $0x38] sm:$0xff]  ;;  %v431_v45 = vld [vmem:[%s4923_s6 + $0x40] sm:$0xff]  ;;  %p4939_p13 = pnand %p597_p5, %p596_p9 }
  0xb6   : > { %3735 = vmatprep.subr.bf16.mxu0 %v4204_v30  ;;  %3743 = vmatprep.mubr.bf16.mxu0 %v435_v33  ;;  %v432_v46 = vld [vmem:[%s4923_s6 + $0x48] sm:$0xff]  ;;  %v438_v47 = vpack.c.bf16 %v430_v44, %v429_v43  ;;  %v433_v49 = vld [vmem:[%s4923_s6 + $0x50] sm:$0xff]  ;;  %v434_v50 = vld [vmem:[%s4923_s6 + $0x58] sm:$0xff]  ;;  %vm754_vm5 = vcmask (!%p4939_p13), 1043456   ;;  %vm632_vm6 = vsmask.f32 (!%p4939_p13), 4368 }
  0xb7   : > { %v439_v48 = vpack.c.bf16 %v432_v46, %v431_v45  ;;  %v440_v51 = vpack.c.bf16 %v434_v50, %v433_v49  ;;  %vm4989_vm7 = vmand (!%p4939_p13), %vm754_vm5, %vm379_vm3 }
  0xb8   : > { %vm4995_vm8 = vmor (!%p4939_p13), %vm359_vm1, %vm632_vm6 }
  0xb9   : > { %3736 = vmatpush3.bf16.msra.mxu0 %v4204_v30 }
  0xba   : > { %3737 = vmatprep.subr.bf16.mxu0 %v4205_v34  ;;  %v3375_v52 = vld [vmem:[%s5585_s27] ss:$0 sm:$0xff] }
  0xbd   : > { %3738 = vmatpush3.bf16.msra.mxu0 %v4205_v34 }
  0xbe   : > { %3739 = vmatprep.subr.bf16.mxu0 %v4206_v35 }
  0xc1   : > { %3740 = vmatpush3.bf16.msra.mxu0 %v4206_v35 }
  0xc2   : > { %3741 = vmatprep.subr.bf16.mxu0 %v4207_v36 }
  0xc5   : > { %3742 = vmatpush3.bf16.msra.mxu0 %v4207_v36 }
  0xc8   : > { %3744 = vmatmul.mubr.bf16.vlgmr.msra.gmra.mrb[0].mxu0 %v436_v41 }
  0xc9   : > { %3747 = vmatprep.mubr.bf16.mxu0 %v437_v42  ;;  %v756_v42 = vld [vmem:[#allocation2] sm:$0xf] (!%p4939_p13) }
  0xd0   : > { %3748 = vmatmul.mubr.bf16.gmra.mrb[4].mxu0 %v438_v47  ;;  %v760_v47 = vld [vmem:[#allocation2 + $0x8] sm:$0x1] (!%p4939_p13) }
  0xd1   : > { %3751 = vmatprep.mubr.bf16.mxu0 %v439_v48 }
  0xd8   : > { %3752 = vmatmul.mubr.bf16.gmra.mrb[8].mxu0 %v440_v51 }
 0x19b   : > { %v3745_v53 = vpop.f32.mrb[0].mxu0 }
 0x19c   : > { %v538_v54 = vadd.f32 %v3745_v53, %v3375_v52  ;;  %v529_v55 = vpop.f32.mrb[1].mxu0 }
 0x19d   : > { %v530_v56 = vadd.f32 %v3375_v52, %v529_v55  ;;  %v3746_v57 = vpop.f32.mrb[2].mxu0 }
 0x19e   : > { %v4946_v58 = vmax.f32 %v538_v54, 0.0  ;;  %v541_v59 = vadd.f32 %v3746_v57, %v3375_v52  ;;  %v532_v60 = vpop.f32.mrb[3].mxu0  ;;  %v767_v57 = vld [vmem:[#allocation2 + $0x14] sm:$0x1] (!%p4939_p13) }
 0x19f   : > { %v4948_v61 = vmax.f32 %v530_v56, 0.0  ;;  %v533_v62 = vadd.f32 %v3375_v52, %v532_v60  ;;  %v763_v56 = vld [vmem:[#allocation2 + $0xc] sm:$0xf] (!%p4939_p13) }
 0x1a0   : > { %v4950_v63 = vmax.f32 %v541_v59, 0.0  ;;  %v3561_v28 = vpack.c.bf16 (!%p4939_p13), %v4946_v58, %v4946_v58 }
 0x1a1   : > { %v4952_v1 = vmax.f32 %v533_v62, 0.0  ;;  %v3559_v26 = vpack.c.bf16 (!%p4939_p13), %v4948_v61, %v4948_v61 }
 0x1a2   : > { %v3562_v29 = vpack.c.bf16 (!%p4939_p13), %v4950_v63, %v4950_v63  ;;  %v652_v36 = vshrl.u32 (!%p4939_p13), %v3561_v28, 16  ;;  %v655_v37 = vshll.u32 (!%p4939_p13), %v3561_v28, 16 }
 0x1a3   : > { %v3749_v2 = vpop.f32.mrb[4].mxu0  ;;  %v3560_v27 = vpack.c.bf16 (!%p4939_p13), %v4952_v1, %v4952_v1  ;;  %v635_v32 = vshrl.u32 (!%p4939_p13), %v3559_v26, 16  ;;  %v638_v33 = vshll.u32 (!%p4939_p13), %v3559_v26, 16 }
 0x1a4   : > { %v554_v3 = vadd.f32 %v3749_v2, %v3375_v52  ;;  %v545_v4 = vpop.f32.mrb[5].mxu0  ;;  %v660_v38 = vshrl.u32 (!%p4939_p13), %v3562_v29, 16  ;;  %v663_v39 = vshll.u32 (!%p4939_p13), %v3562_v29, 16  ;;  %v654_v48 = vrot.slane (!%p4939_p13), %v652_v36, 7 }
 0x1a5   : > { %v546_v5 = vadd.f32 %v3375_v52, %v545_v4  ;;  %v3750_v6 = vpop.f32.mrb[6].mxu0  ;;  %v643_v34 = vshrl.u32 (!%p4939_p13), %v3560_v27, 16  ;;  %v646_v35 = vshll.u32 (!%p4939_p13), %v3560_v27, 16  ;;  %v637_v40 = vrot.slane (!%p4939_p13), %v635_v32, 7 }
 0x1a6   : > { %v4954_v7 = vmax.f32 %v554_v3, 0.0  ;;  %v557_v8 = vadd.f32 %v3750_v6, %v3375_v52  ;;  %v548_v9 = vpop.f32.mrb[7].mxu0  ;;  %v662_v49 = vrot.slane (!%p4939_p13), %v660_v38, 7  ;;  %v657_v59 = vor.u32 (!%p4939_p13), %v655_v37, %v654_v48 }
 0x1a7   : > { %v4956_v10 = vmax.f32 %v546_v5, 0.0  ;;  %v549_v11 = vadd.f32 %v3375_v52, %v548_v9  ;;  %v645_v43 = vrot.slane (!%p4939_p13), %v643_v34, 7  ;;  %v641_v53 = vrot.slane (!%p4939_p13), %v637_v40, 4 }
 0x1a8   : > { %v4958_v12 = vmax.f32 %v557_v8, 0.0  ;;  %v658_v60 = vrot.slane (!%p4939_p13), %v654_v48, 4  ;;  %v665_v62 = vor.u32 (!%p4939_p13), %v663_v39, %v662_v49  ;;  %v667_v2 = vrot.slane (!%p4939_p13), %v662_v49, 4 }
 0x1a9   : > { %v4960_v13 = vmax.f32 %v549_v11, 0.0  ;;  %v3563_v30 = vpack.c.bf16 (!%p4939_p13), %v4956_v10, %v4956_v10  ;;  %v648_v54 = vor.u32 (!%p4939_p13), %v646_v35, %v645_v43  ;;  %v650_v55 = vrot.slane (!%p4939_p13), %v645_v43, 4  ;;  %v781_v43 = vld [vmem:[#allocation2 + $0x2c] sm:$0x1] (!%p4939_p13) }
 0x1aa   : > { %v764_v8 = vsel (!%p4939_p13), %vm4989_vm7, %v657_v59, %v763_v56  ;;  %v666_v9 = vsel (!%p4939_p13), %vm4995_vm8, %v658_v60, %v665_v62  ;;  %v768_v11 = vsel (!%p4939_p13), %vm4880_vm2, %v667_v2, %v767_v57  ;;  %v788_v2 = vld [vmem:[#allocation2 + $0x38] sm:$0x1] (!%p4939_p13) }
 0x1ab   : > { %v3753_v14 = vpop.f32.mrb[8].mxu0  ;;  %601 = sbr.rel (%p4939_p13) target bundleno = 451 (0x1c3), region = 68  ;;  %v3564_v31 = vpack.c.bf16 (!%p4939_p13), %v4960_v13, %v4960_v13  ;;  %v669_v44 = vshrl.u32 (!%p4939_p13), %v3563_v30, 16  ;;  %v672_v45 = vshll.u32 (!%p4939_p13), %v3563_v30, 16  ;;  %v649_v4 = vsel (!%p4939_p13), %vm4995_vm8, %v641_v53, %v648_v54  ;;  %765 = vst [vmem:[#allocation2 + $0xc] sm:$0xf] (!%p4939_p13), %v764_v8 }
 0x1ac   : > { %v570_v15 = vadd.f32 %v3753_v14, %v3375_v52  ;;  %v561_v16 = vpop.f32.mrb[9].mxu0  ;;  %v761_v5 = vsel (!%p4939_p13), %vm4880_vm2, %v650_v55, %v760_v47  ;;  %759 = vst [vmem:[#allocation2 + $0x4] sm:$0xf] (!%p4939_p13), %v649_v4  ;;  %v770_v14 = vld [vmem:[#allocation2 + $0x18] sm:$0xf] (!%p4939_p13) }
 0x1ad   : > { %v562_v17 = vadd.f32 %v3375_v52, %v561_v16  ;;  %v3754_v18 = vpop.f32.mrb[10].mxu0  ;;  %v677_v50 = vshrl.u32 (!%p4939_p13), %v3564_v31, 16  ;;  %v680_v51 = vshll.u32 (!%p4939_p13), %v3564_v31, 16  ;;  %v671_v6 = vrot.slane (!%p4939_p13), %v669_v44, 7  ;;  %762 = vst [vmem:[#allocation2 + $0x8] sm:$0x1] (!%p4939_p13), %v761_v5 }
 0x1ae   : > { %v4962_v19 = vmax.f32 %v570_v15, 0.0  ;;  %v573_v20 = vadd.f32 %v3754_v18, %v3375_v52  ;;  %v564_v21 = vpop.f32.mrb[11].mxu0  ;;  %766 = vst [vmem:[#allocation2 + $0x10] sm:$0xf] (!%p4939_p13), %v666_v9  ;;  %769 = vst [vmem:[#allocation2 + $0x14] sm:$0x1] (!%p4939_p13), %v768_v11 }
 0x1af   : > { %v4964_v22 = vmax.f32 %v562_v17, 0.0  ;;  %v565_v23 = vadd.f32 %v3375_v52, %v564_v21  ;;  %v640_v52 = vor.u32 (!%p4939_p13), %v638_v33, %v637_v40  ;;  %v679_v15 = vrot.slane (!%p4939_p13), %v677_v50, 7  ;;  %v774_v18 = vld [vmem:[#allocation2 + $0x20] sm:$0x1] (!%p4939_p13)  ;;  %v784_v53 = vld [vmem:[#allocation2 + $0x30] sm:$0xf] (!%p4939_p13) }
 0x1b0   : > { %v4966_v24 = vmax.f32 %v573_v20, 0.0  ;;  %v674_v16 = vor.u32 (!%p4939_p13), %v672_v45, %v671_v6  ;;  %v675_v17 = vrot.slane (!%p4939_p13), %v671_v6, 4  ;;  %v3565_v20 = vpack.c.bf16 (!%p4939_p13), %v4954_v7, %v4954_v7  ;;  %v791_v9 = vld [vmem:[#allocation2 + $0x3c] sm:$0xf] (!%p4939_p13) }
 0x1b1   : > { %v4968_v25 = vmax.f32 %v565_v23, 0.0  ;;  %v757_v3 = vsel (!%p4939_p13), %vm4989_vm7, %v640_v52, %v756_v42  ;;  %v3566_v21 = vpack.c.bf16 (!%p4939_p13), %v4958_v12, %v4958_v12  ;;  %v682_v23 = vor.u32 (!%p4939_p13), %v680_v51, %v679_v15  ;;  %v777_v42 = vld [vmem:[#allocation2 + $0x24] sm:$0xf] (!%p4939_p13) }
 0x1b2   : > { %758 = vst [vmem:[#allocation2] sm:$0xf] %v757_v3  ;;  %v684_v26 = vrot.slane %v679_v15, 4  ;;  %v3567_v27 = vpack.c.bf16 %v4964_v22, %v4964_v22  ;;  %v771_v29 = vsel %vm4989_vm7, %v674_v16, %v770_v14  ;;  %v686_v30 = vshrl.u32 %v3565_v20, 16 }
 0x1b3   : > { %v3568_v28 = vpack.c.bf16 %v4968_v25, %v4968_v25  ;;  %v689_v31 = vshll.u32 %v3565_v20, 16  ;;  %v694_v32 = vshrl.u32 %v3566_v21, 16  ;;  %772 = vst [vmem:[#allocation2 + $0x18] sm:$0xf] %v771_v29  ;;  %v683_v33 = vsel %vm4995_vm8, %v675_v17, %v682_v23  ;;  %v795_v23 = vld [vmem:[#allocation2 + $0x44] sm:$0x1] }
 0x1b4   : > { %v775_v34 = vsel %vm4880_vm2, %v684_v26, %v774_v18  ;;  %v697_v35 = vshll.u32 %v3566_v21, 16  ;;  %v703_v36 = vshrl.u32 %v3567_v27, 16  ;;  %773 = vst [vmem:[#allocation2 + $0x1c] sm:$0xf] %v683_v33  ;;  %v688_v37 = vrot.slane %v686_v30, 7 }
 0x1b5   : > { %776 = vst [vmem:[#allocation2 + $0x20] sm:$0x1] %v775_v34  ;;  %v696_v38 = vrot.slane %v694_v32, 7  ;;  %v706_v39 = vshll.u32 %v3567_v27, 16  ;;  %v711_v40 = vshrl.u32 %v3568_v28, 16  ;;  %v714_v45 = vshll.u32 %v3568_v28, 16 }
 0x1b6   : > { %v705_v44 = vrot.slane %v703_v36, 7  ;;  %v3569_v47 = vpack.c.bf16 %v4962_v19, %v4962_v19  ;;  %v3570_v48 = vpack.c.bf16 %v4966_v24, %v4966_v24  ;;  %v691_v49 = vor.u32 %v689_v31, %v688_v37 }
 0x1b7   : > { %v692_v50 = vrot.slane %v688_v37, 4  ;;  %v699_v51 = vor.u32 %v697_v35, %v696_v38  ;;  %v701_v52 = vrot.slane %v696_v38, 4  ;;  %v713_v56 = vrot.slane %v711_v40, 7 }
 0x1b8   : > { %v708_v54 = vor.u32 %v706_v39, %v705_v44  ;;  %v709_v55 = vrot.slane %v705_v44, 4  ;;  %v720_v57 = vshrl.u32 %v3569_v47, 16  ;;  %v778_v59 = vsel %vm4989_vm7, %v691_v49, %v777_v42 }
 0x1b9   : > { %v700_v60 = vsel %vm4995_vm8, %v692_v50, %v699_v51  ;;  %v782_v62 = vsel %vm4880_vm2, %v701_v52, %v781_v43  ;;  %v723_v3 = vshll.u32 %v3569_v47, 16  ;;  %779 = vst [vmem:[#allocation2 + $0x24] sm:$0xf] %v778_v59  ;;  %v716_v5 = vor.u32 %v714_v45, %v713_v56 }
 0x1ba   : > { %780 = vst [vmem:[#allocation2 + $0x28] sm:$0xf] %v700_v60  ;;  %783 = vst [vmem:[#allocation2 + $0x2c] sm:$0x1] %v782_v62  ;;  %v785_v4 = vsel %vm4989_vm7, %v708_v54, %v784_v53  ;;  %v718_v6 = vrot.slane %v713_v56, 4  ;;  %v722_v8 = vrot.slane %v720_v57, 7 }
 0x1bb   : > { %786 = vst [vmem:[#allocation2 + $0x30] sm:$0xf] %v785_v4  ;;  %v728_v11 = vshrl.u32 %v3570_v48, 16  ;;  %v731_v14 = vshll.u32 %v3570_v48, 16  ;;  %v717_v15 = vsel %vm4995_vm8, %v709_v55, %v716_v5 }
 0x1bc   : > { %v789_v16 = vsel %vm4880_vm2, %v718_v6, %v788_v2  ;;  %v725_v17 = vor.u32 %v723_v3, %v722_v8  ;;  %787 = vst [vmem:[#allocation2 + $0x34] sm:$0xf] %v717_v15  ;;  %v726_v18 = vrot.slane %v722_v8, 4 }
 0x1bd   : > { %790 = vst [vmem:[#allocation2 + $0x38] sm:$0x1] %v789_v16  ;;  %v730_v20 = vrot.slane %v728_v11, 7 }
 0x1be   : > { %v792_v21 = vsel %vm4989_vm7, %v725_v17, %v791_v9 }
 0x1bf   : > { %793 = vst [vmem:[#allocation2 + $0x3c] sm:$0xf] %v792_v21  ;;  %v733_v26 = vor.u32 %v731_v14, %v730_v20  ;;  %v735_v27 = vrot.slane %v730_v20, 4 }
 0x1c1   : > { %v734_v28 = vsel %vm4995_vm8, %v726_v18, %v733_v26  ;;  %v796_v29 = vsel %vm4880_vm2, %v735_v27, %v795_v23 }
 0x1c2   : > { %794 = vst [vmem:[#allocation2 + $0x40] sm:$0xf] %v734_v28  ;;  %797 = vst [vmem:[#allocation2 + $0x44] sm:$0x1] %v796_v29 }
 0x1c3 PF: > { %p3396_p6 = scmp.ne.s32.totalorder %s4528_s30, 0 }
 0x1c4   : > { %v3571_v41 = vpack.c.bf16 (!%p3396_p6), %v4948_v61, %v4948_v61  ;;  %vm929_vm9 = vcmask (!%p3396_p6), 1043456   ;;  %v3572_v30 = vpack.c.bf16 (!%p3396_p6), %v4952_v1, %v4952_v1  ;;  %vm826_vm10 = vsmask.f32 (!%p3396_p6), 4368  ;;  %v931_v43 = vld [vmem:[#allocation2 + $0xc] sm:$0xf] (!%p3396_p6) }
 0x1c5   : > { %800 = sbr.rel (%p3396_p6) target bundleno = 476 (0x1dc), region = 72  ;;  %v3573_v46 = vpack.c.bf16 (!%p3396_p6), %v4946_v58, %v4946_v58  ;;  %v3574_v31 = vpack.c.bf16 (!%p3396_p6), %v4950_v63, %v4950_v63  ;;  %v3575_v32 = vpack.c.bf16 (!%p3396_p6), %v4956_v10, %v4956_v10  ;;  %v3576_v33 = vpack.c.bf16 (!%p3396_p6), %v4960_v13, %v4960_v13  ;;  %vm5062_vm11 = vmand (!%p3396_p6), %vm929_vm9, %vm379_vm3  ;;  %v938_v59 = vld [vmem:[#allocation2 + $0x18] sm:$0xf] (!%p3396_p6)  ;;  %v942_v60 = vld [vmem:[#allocation2 + $0x20] sm:$0x1] (!%p3396_p6) }
 0x1c6   : > { %v829_v34 = vshrl.u32 (!%p3396_p6), %v3571_v41, 16  ;;  %v832_v35 = vshll.u32 (!%p3396_p6), %v3571_v41, 16  ;;  %v837_v61 = vshrl.u32 (!%p3396_p6), %v3572_v30, 16  ;;  %v840_v36 = vshll.u32 (!%p3396_p6), %v3572_v30, 16  ;;  %vm5068_vm12 = vmor (!%p3396_p6), %vm359_vm1, %vm826_vm10  ;;  %v935_v49 = vld [vmem:[#allocation2 + $0x14] sm:$0x1] (!%p3396_p6) }
 0x1c7   : > { %v846_v37 = vshrl.u32 (!%p3396_p6), %v3573_v46, 16  ;;  %v849_v38 = vshll.u32 (!%p3396_p6), %v3573_v46, 16  ;;  %v854_v1 = vshrl.u32 (!%p3396_p6), %v3574_v31, 16  ;;  %v857_v39 = vshll.u32 (!%p3396_p6), %v3574_v31, 16  ;;  %v945_v16 = vld [vmem:[#allocation2 + $0x24] sm:$0xf] (!%p3396_p6) }
 0x1c8   : > { %v831_v40 = vrot.slane (!%p3396_p6), %v829_v34, 7  ;;  %v839_v44 = vrot.slane (!%p3396_p6), %v837_v61, 7  ;;  %v863_v45 = vshrl.u32 (!%p3396_p6), %v3575_v32, 16  ;;  %v866_v47 = vshll.u32 (!%p3396_p6), %v3575_v32, 16  ;;  %v949_v21 = vld [vmem:[#allocation2 + $0x2c] sm:$0x1] (!%p3396_p6) }
 0x1c9   : > { %v848_v50 = vrot.slane (!%p3396_p6), %v846_v37, 7  ;;  %v856_v51 = vrot.slane (!%p3396_p6), %v854_v1, 7  ;;  %v871_v52 = vshrl.u32 (!%p3396_p6), %v3576_v33, 16  ;;  %v874_v53 = vshll.u32 (!%p3396_p6), %v3576_v33, 16  ;;  %v966_v33 = vld [vmem:[#allocation2] sm:$0xf] (!%p3396_p6) }
 0x1ca   : > { %v834_v54 = vor.u32 (!%p3396_p6), %v832_v35, %v831_v40  ;;  %v835_v55 = vrot.slane (!%p3396_p6), %v831_v40, 4  ;;  %v842_v56 = vor.u32 (!%p3396_p6), %v840_v36, %v839_v44  ;;  %v844_v57 = vrot.slane (!%p3396_p6), %v839_v44, 4  ;;  %v952_v61 = vld [vmem:[#allocation2 + $0x30] sm:$0xf] (!%p3396_p6)  ;;  %v956_v44 = vld [vmem:[#allocation2 + $0x38] sm:$0x1] (!%p3396_p6) }
 0x1cb   : > { %v851_v62 = vor.u32 (!%p3396_p6), %v849_v38, %v848_v50  ;;  %v852_v2 = vrot.slane (!%p3396_p6), %v848_v50, 4  ;;  %v859_v3 = vor.u32 (!%p3396_p6), %v857_v39, %v856_v51  ;;  %v861_v4 = vrot.slane (!%p3396_p6), %v856_v51, 4 }
 0x1cc   : > { %v932_v5 = vsel %vm5062_vm11, %v834_v54, %v931_v43  ;;  %v843_v6 = vsel %vm5068_vm12, %v835_v55, %v842_v56  ;;  %v936_v8 = vsel %vm4880_vm2, %v844_v57, %v935_v49  ;;  %v865_v9 = vrot.slane %v863_v45, 7  ;;  %v970_v43 = vld [vmem:[#allocation2 + $0x8] sm:$0x1]  ;;  %v959_v54 = vld [vmem:[#allocation2 + $0x3c] sm:$0xf] }
 0x1cd   : > { %933 = vst [vmem:[#allocation2 + $0xc] sm:$0xf] %v932_v5  ;;  %934 = vst [vmem:[#allocation2 + $0x10] sm:$0xf] %v843_v6  ;;  %v939_v11 = vsel %vm5062_vm11, %v851_v62, %v938_v59  ;;  %v860_v14 = vsel %vm5068_vm12, %v852_v2, %v859_v3  ;;  %v943_v15 = vsel %vm4880_vm2, %v861_v4, %v942_v60  ;;  %v873_v17 = vrot.slane %v871_v52, 7 }
 0x1ce   : > { %937 = vst [vmem:[#allocation2 + $0x14] sm:$0x1] %v936_v8  ;;  %940 = vst [vmem:[#allocation2 + $0x18] sm:$0xf] %v939_v11  ;;  %v868_v18 = vor.u32 %v866_v47, %v865_v9  ;;  %v869_v20 = vrot.slane %v865_v9, 4  ;;  %v3577_v23 = vpack.c.bf16 %v4954_v7, %v4954_v7  ;;  %v3578_v26 = vpack.c.bf16 %v4958_v12, %v4958_v12 }
 0x1cf   : > { %941 = vst [vmem:[#allocation2 + $0x1c] sm:$0xf] %v860_v14  ;;  %944 = vst [vmem:[#allocation2 + $0x20] sm:$0x1] %v943_v15  ;;  %v876_v27 = vor.u32 %v874_v53, %v873_v17  ;;  %v878_v28 = vrot.slane %v873_v17, 4  ;;  %v3579_v29 = vpack.c.bf16 %v4964_v22, %v4964_v22  ;;  %v3580_v41 = vpack.c.bf16 %v4968_v25, %v4968_v25 }
 0x1d0   : > { %v946_v30 = vsel %vm5062_vm11, %v868_v18, %v945_v16  ;;  %v880_v46 = vshrl.u32 %v3577_v23, 16  ;;  %v883_v31 = vshll.u32 %v3577_v23, 16  ;;  %v888_v32 = vshrl.u32 %v3578_v26, 16  ;;  %v963_v4 = vld [vmem:[#allocation2 + $0x44] sm:$0x1] }
 0x1d1   : > { %947 = vst [vmem:[#allocation2 + $0x24] sm:$0xf] %v946_v30  ;;  %v877_v34 = vsel %vm5068_vm12, %v869_v20, %v876_v27  ;;  %v950_v35 = vsel %vm4880_vm2, %v878_v28, %v949_v21  ;;  %v891_v36 = vshll.u32 %v3578_v26, 16  ;;  %v897_v37 = vshrl.u32 %v3579_v29, 16 }
 0x1d2   : > { %948 = vst [vmem:[#allocation2 + $0x28] sm:$0xf] %v877_v34  ;;  %951 = vst [vmem:[#allocation2 + $0x2c] sm:$0x1] %v950_v35  ;;  %v882_v38 = vrot.slane %v880_v46, 7  ;;  %v890_v1 = vrot.slane %v888_v32, 7 }
 0x1d3   : > { %v900_v39 = vshll.u32 %v3579_v29, 16  ;;  %v905_v40 = vshrl.u32 %v3580_v41, 16  ;;  %v899_v45 = vrot.slane %v897_v37, 7  ;;  %v908_v47 = vshll.u32 %v3580_v41, 16 }
 0x1d4   : > { %v967_v49 = vsel %vm5062_vm11, 0, %v966_v33  ;;  %v885_v50 = vor.u32 %v883_v31, %v882_v38  ;;  %v886_v51 = vrot.slane %v882_v38, 4  ;;  %v893_v52 = vor.u32 %v891_v36, %v890_v1 }
 0x1d5   : > { %v895_v53 = vrot.slane %v890_v1, 4  ;;  %968 = vst [vmem:[#allocation2] sm:$0xf] %v967_v49  ;;  %v4554_v55 = vmov 0   ;;  %v902_v56 = vor.u32 %v900_v39, %v899_v45  ;;  %v903_v57 = vrot.slane %v899_v45, 4 }
 0x1d6   : > { %969 = vst [vmem:[#allocation2 + $0x4] sm:$0xf] %v4554_v55  ;;  %v907_v59 = vrot.slane %v905_v40, 7  ;;  %v971_v60 = vsel %vm4880_vm2, 0, %v970_v43  ;;  %v953_v62 = vsel %vm5062_vm11, %v885_v50, %v952_v61  ;;  %v894_v2 = vsel %vm5068_vm12, %v886_v51, %v893_v52 }
 0x1d7   : > { %v957_v3 = vsel %vm4880_vm2, %v895_v53, %v956_v44  ;;  %972 = vst [vmem:[#allocation2 + $0x8] sm:$0x1] %v971_v60  ;;  %954 = vst [vmem:[#allocation2 + $0x30] sm:$0xf] %v953_v62  ;;  %v960_v5 = vsel %vm5062_vm11, %v902_v56, %v959_v54 }
 0x1d8   : > { %955 = vst [vmem:[#allocation2 + $0x34] sm:$0xf] %v894_v2  ;;  %958 = vst [vmem:[#allocation2 + $0x38] sm:$0x1] %v957_v3  ;;  %v910_v6 = vor.u32 %v908_v47, %v907_v59  ;;  %v912_v8 = vrot.slane %v907_v59, 4 }
 0x1d9   : > { %961 = vst [vmem:[#allocation2 + $0x3c] sm:$0xf] %v960_v5 }
 0x1da   : > { %v911_v9 = vsel %vm5068_vm12, %v903_v57, %v910_v6  ;;  %v964_v11 = vsel %vm4880_vm2, %v912_v8, %v963_v4 }
 0x1db   : > { %962 = vst [vmem:[#allocation2 + $0x40] sm:$0xf] %v911_v9  ;;  %965 = vst [vmem:[#allocation2 + $0x44] sm:$0x1] %v964_v11 }
 0x1dc PF: > { %p3407_p8 = scmp.ne.s32.totalorder %s4528_s30, 3 }
 0x1dd   : > { %v3581_v14 = vpack.c.bf16 (!%p3407_p8), %v4946_v58, %v4946_v58  ;;  %vm1103_vm13 = vcmask (!%p3407_p8), 1043456   ;;  %v3582_v42 = vpack.c.bf16 (!%p3407_p8), %v4950_v63, %v4950_v63  ;;  %vm1001_vm14 = vsmask.f32 (!%p3407_p8), 4368  ;;  %v1112_v37 = vld [vmem:[#allocation2 + $0xc] sm:$0xf] (!%p3407_p8) }
 0x1de   : > { %975 = sbr.rel (%p3407_p8) target bundleno = 501 (0x1f5), region = 76  ;;  %v3583_v48 = vpack.c.bf16 (!%p3407_p8), %v4956_v10, %v4956_v10  ;;  %v3584_v15 = vpack.c.bf16 (!%p3407_p8), %v4960_v13, %v4960_v13  ;;  %v3585_v16 = vpack.c.bf16 (!%p3407_p8), %v4954_v7, %v4954_v7  ;;  %v3586_v17 = vpack.c.bf16 (!%p3407_p8), %v4958_v12, %v4958_v12  ;;  %vm5129_vm15 = vmand (!%p3407_p8), %vm1103_vm13, %vm379_vm3  ;;  %v1105_v13 = vld [vmem:[#allocation2] sm:$0xf] (!%p3407_p8)  ;;  %v1109_v30 = vld [vmem:[#allocation2 + $0x8] sm:$0x1] (!%p3407_p8) }
 0x1df   : > { %v1004_v18 = vshrl.u32 (!%p3407_p8), %v3581_v14, 16  ;;  %v1007_v20 = vshll.u32 (!%p3407_p8), %v3581_v14, 16  ;;  %v1012_v58 = vshrl.u32 (!%p3407_p8), %v3582_v42, 16  ;;  %v1015_v21 = vshll.u32 (!%p3407_p8), %v3582_v42, 16  ;;  %vm5135_vm0 = vmor (!%p3407_p8), %vm359_vm1, %vm1001_vm14  ;;  %v1116_v38 = vld [vmem:[#allocation2 + $0x14] sm:$0x1] (!%p3407_p8) }
 0x1e0   : > { %v1021_v23 = vshrl.u32 (!%p3407_p8), %v3583_v48, 16  ;;  %v1024_v26 = vshll.u32 (!%p3407_p8), %v3583_v48, 16  ;;  %v1029_v63 = vshrl.u32 (!%p3407_p8), %v3584_v15, 16  ;;  %v1032_v27 = vshll.u32 (!%p3407_p8), %v3584_v15, 16  ;;  %v1119_v53 = vld [vmem:[#allocation2 + $0x18] sm:$0xf] (!%p3407_p8) }
 0x1e1   : > { %v1006_v28 = vrot.slane (!%p3407_p8), %v1004_v18, 7  ;;  %v1014_v7 = vrot.slane (!%p3407_p8), %v1012_v58, 7  ;;  %v1038_v29 = vshrl.u32 (!%p3407_p8), %v3585_v16, 16  ;;  %v1041_v41 = vshll.u32 (!%p3407_p8), %v3585_v16, 16  ;;  %v1123_v57 = vld [vmem:[#allocation2 + $0x20] sm:$0x1] (!%p3407_p8) }
 0x1e2   : > { %v1023_v46 = vrot.slane (!%p3407_p8), %v1021_v23, 7  ;;  %v1031_v31 = vrot.slane (!%p3407_p8), %v1029_v63, 7  ;;  %v1046_v32 = vshrl.u32 (!%p3407_p8), %v3586_v17, 16  ;;  %v1049_v33 = vshll.u32 (!%p3407_p8), %v3586_v17, 16  ;;  %v1141_v11 = vld [vmem:[#allocation2 + $0x3c] sm:$0xf] (!%p3407_p8) }
 0x1e3   : > { %v1009_v34 = vor.u32 (!%p3407_p8), %v1007_v20, %v1006_v28  ;;  %v1010_v35 = vrot.slane (!%p3407_p8), %v1006_v28, 4  ;;  %v1017_v61 = vor.u32 (!%p3407_p8), %v1015_v21, %v1014_v7  ;;  %v1019_v36 = vrot.slane (!%p3407_p8), %v1014_v7, 4  ;;  %v1126_v14 = vld [vmem:[#allocation2 + $0x24] sm:$0xf] (!%p3407_p8)  ;;  %v1130_v18 = vld [vmem:[#allocation2 + $0x2c] sm:$0x1] (!%p3407_p8) }
 0x1e4   : > { %v1026_v1 = vor.u32 (!%p3407_p8), %v1024_v26, %v1023_v46  ;;  %v1027_v39 = vrot.slane (!%p3407_p8), %v1023_v46, 4  ;;  %v1034_v40 = vor.u32 (!%p3407_p8), %v1032_v27, %v1031_v31  ;;  %v1036_v43 = vrot.slane (!%p3407_p8), %v1031_v31, 4  ;;  %v1145_v17 = vld [vmem:[#allocation2 + $0x44] sm:$0x1] (!%p3407_p8)  ;;  %v1133_v28 = vld [vmem:[#allocation2 + $0x30] sm:$0xf] (!%p3407_p8) }
 0x1e5   : > { %v1106_v44 = vsel %vm5129_vm15, %v1009_v34, %v1105_v13  ;;  %v1018_v45 = vsel %vm5135_vm0, %v1010_v35, %v1017_v61  ;;  %v1110_v47 = vsel %vm4880_vm2, %v1019_v36, %v1109_v30  ;;  %v1040_v49 = vrot.slane %v1038_v29, 7 }
 0x1e6   : > { %1107 = vst [vmem:[#allocation2] sm:$0xf] %v1106_v44  ;;  %1108 = vst [vmem:[#allocation2 + $0x4] sm:$0xf] %v1018_v45  ;;  %v1113_v50 = vsel %vm5129_vm15, %v1026_v1, %v1112_v37  ;;  %v1035_v51 = vsel %vm5135_vm0, %v1027_v39, %v1034_v40  ;;  %v1117_v52 = vsel %vm4880_vm2, %v1036_v43, %v1116_v38  ;;  %v1048_v54 = vrot.slane %v1046_v32, 7 }
 0x1e7   : > { %1111 = vst [vmem:[#allocation2 + $0x8] sm:$0x1] %v1110_v47  ;;  %1114 = vst [vmem:[#allocation2 + $0xc] sm:$0xf] %v1113_v50  ;;  %v1043_v55 = vor.u32 %v1041_v41, %v1040_v49  ;;  %v1044_v56 = vrot.slane %v1040_v49, 4  ;;  %v3587_v59 = vpack.c.bf16 %v4964_v22, %v4964_v22  ;;  %v3588_v60 = vpack.c.bf16 %v4968_v25, %v4968_v25 }
 0x1e8   : > { %1115 = vst [vmem:[#allocation2 + $0x10] sm:$0xf] %v1035_v51  ;;  %1118 = vst [vmem:[#allocation2 + $0x14] sm:$0x1] %v1117_v52  ;;  %v1051_v62 = vor.u32 %v1049_v33, %v1048_v54  ;;  %v1053_v2 = vrot.slane %v1048_v54, 4  ;;  %v3589_v3 = vpack.c.bf16 %v4962_v19, %v4962_v19  ;;  %v3590_v4 = vpack.c.bf16 %v4966_v24, %v4966_v24 }
 0x1e9   : > { %v1120_v5 = vsel %vm5129_vm15, %v1043_v55, %v1119_v53  ;;  %v1055_v6 = vshrl.u32 %v3587_v59, 16  ;;  %v1058_v8 = vshll.u32 %v3587_v59, 16  ;;  %v1063_v9 = vshrl.u32 %v3588_v60, 16  ;;  %v1137_v33 = vld [vmem:[#allocation2 + $0x38] sm:$0x1] }
 0x1ea   : > { %1121 = vst [vmem:[#allocation2 + $0x18] sm:$0xf] %v1120_v5  ;;  %v1052_v22 = vsel %vm5135_vm0, %v1044_v56, %v1051_v62  ;;  %v1124_v25 = vsel %vm4880_vm2, %v1053_v2, %v1123_v57  ;;  %v1066_v42 = vshll.u32 %v3588_v60, 16  ;;  %v1072_v19 = vshrl.u32 %v3589_v3, 16 }
 0x1eb   : > { %1122 = vst [vmem:[#allocation2 + $0x1c] sm:$0xf] %v1052_v22  ;;  %1125 = vst [vmem:[#allocation2 + $0x20] sm:$0x1] %v1124_v25  ;;  %v1057_v24 = vrot.slane %v1055_v6, 7  ;;  %v1065_v48 = vrot.slane %v1063_v9, 7 }
 0x1ec   : > { %v1075_v15 = vshll.u32 %v3589_v3, 16  ;;  %v1080_v16 = vshrl.u32 %v3590_v4, 16  ;;  %v1074_v20 = vrot.slane %v1072_v19, 7  ;;  %v1083_v58 = vshll.u32 %v3590_v4, 16 }
 0x1ed   : > { %v1142_v21 = vsel %vm5129_vm15, 0, %v1141_v11  ;;  %v1060_v23 = vor.u32 %v1058_v8, %v1057_v24  ;;  %v1061_v26 = vrot.slane %v1057_v24, 4  ;;  %v1068_v63 = vor.u32 %v1066_v42, %v1065_v48 }
 0x1ee   : > { %v1070_v27 = vrot.slane %v1065_v48, 4  ;;  %1143 = vst [vmem:[#allocation2 + $0x3c] sm:$0xf] %v1142_v21  ;;  %v4555_v13 = vmov 0   ;;  %v1077_v7 = vor.u32 %v1075_v15, %v1074_v20  ;;  %v1078_v29 = vrot.slane %v1074_v20, 4 }
 0x1ef   : > { %1144 = vst [vmem:[#allocation2 + $0x40] sm:$0xf] %v4555_v13  ;;  %v1082_v41 = vrot.slane %v1080_v16, 7  ;;  %v1146_v30 = vsel %vm4880_vm2, 0, %v1145_v17  ;;  %v1127_v46 = vsel %vm5129_vm15, %v1060_v23, %v1126_v14  ;;  %v1069_v31 = vsel %vm5135_vm0, %v1061_v26, %v1068_v63 }
 0x1f0   : > { %v1131_v32 = vsel %vm4880_vm2, %v1070_v27, %v1130_v18  ;;  %1147 = vst [vmem:[#allocation2 + $0x44] sm:$0x1] %v1146_v30  ;;  %1128 = vst [vmem:[#allocation2 + $0x24] sm:$0xf] %v1127_v46  ;;  %v1134_v34 = vsel %vm5129_vm15, %v1077_v7, %v1133_v28 }
 0x1f1   : > { %1129 = vst [vmem:[#allocation2 + $0x28] sm:$0xf] %v1069_v31  ;;  %1132 = vst [vmem:[#allocation2 + $0x2c] sm:$0x1] %v1131_v32  ;;  %v1085_v35 = vor.u32 %v1083_v58, %v1082_v41  ;;  %v1087_v61 = vrot.slane %v1082_v41, 4 }
 0x1f2   : > { %1135 = vst [vmem:[#allocation2 + $0x30] sm:$0xf] %v1134_v34 }
 0x1f3   : > { %v1086_v36 = vsel %vm5135_vm0, %v1078_v29, %v1085_v35  ;;  %v1138_v37 = vsel %vm4880_vm2, %v1087_v61, %v1137_v33 }
 0x1f4   : > { %1136 = vst [vmem:[#allocation2 + $0x34] sm:$0xf] %v1086_v36  ;;  %1139 = vst [vmem:[#allocation2 + $0x38] sm:$0x1] %v1138_v37 }
 0x1f5 PF: > { %v4208_v38 = vld [vmem:[#allocation8 + $0xc0] sm:$0xff]   ;;  %v4209_v1 = vld [vmem:[#allocation8 + $0xc8] sm:$0xff]   ;;  %v4210_v39 = vld [vmem:[#allocation8 + $0xd0] sm:$0xff]   ;;  %vm1176_vm1 = vsmask.f32 3328  ;;  %vm1570_vm4 = vcmask 1042432  }
 0x1f6   : > { %3827 = vmatprep.subr.bf16.mxu1 %v4208_v38  ;;  %v4211_v10 = vld [vmem:[#allocation8 + $0xd8] sm:$0xff]   ;;  %v4216_v40 = vld [vmem:[#allocation8 + $0x40] sm:$0xff]   ;;  %v4220_v0 = vld [vmem:[#allocation8 + $0x48] sm:$0xff]   ;;  %vm1177_vm2 = vsmask.f32 7440  ;;  %vm1571_vm5 = vcmask 1046532  }
 0x1f7   : > { %3828 = vmatpush3.bf16.msra.mxu1 %v4208_v38  ;;  %v4217_v43 = vld [vmem:[#allocation2 + $0xc] sm:$0xff]   ;;  %3755 = vmatprep.subr.bf16.mxu0 %v4216_v40  ;;  %v4222_v44 = vld [vmem:[#allocation8 + $0x50] sm:$0xff]   ;;  %v4224_v47 = vld [vmem:[#allocation8 + $0x58] sm:$0xff]   ;;  %s5602_s18 = sld [smem:[#allocation23_spill]]  ;;  %s3591_s19 = sshll.u32 %s4528_s30, 6 }
 0x1f8   : > { %3829 = vmatprep.subr.bf16.mxu1 %v4209_v1  ;;  %v4212_v12 = vld [vmem:[#allocation8 + $0xe0] sm:$0xff]   ;;  %3756 = vmatpush3.bf16.msra.mxu0 %v4216_v40  ;;  %v4213_v45 = vld [vmem:[#allocation8 + $0xe8] sm:$0xff]   ;;  %v4214_v49 = vld [vmem:[#allocation8 + $0xf0] sm:$0xff]   ;;  %s5443_s16 = scalar_lea.vmem %s312_s20, %s3591_s19 [#allocation3]  ;;  %s5603_s5 = sld [smem:[#allocation24_spill]] }
 0x1f9   : > { %3843 = vmatprep.mubr.bf16.mxu1 %v4217_v43  ;;  %3757 = vmatprep.subr.bf16.mxu0 %v4220_v0  ;;  %v4226_v50 = vld [vmem:[#allocation8 + $0x60] sm:$0xff]   ;;  %v4215_v51 = vld [vmem:[#allocation8 + $0xf8] sm:$0xff]   ;;  %v4228_v52 = vld [vmem:[#allocation8 + $0x68] sm:$0xff]   ;;  %s5604_s6 = sld [smem:[#allocation17_spill]]  ;;  %s3592_s13 = sshll.u32 %s4528_s30, 3 }
 0x1fa   : > { %v4218_v53 = vld [vmem:[#allocation8 + $0x100] sm:$0xff]   ;;  %v4230_v54 = vld [vmem:[#allocation8 + $0x70] sm:$0xff]   ;;  %v5181_v55 = vld [vmem:[#allocation2] sm:$0xf]  ;;  %s3231_s12 = sshll.u32 %s4971_s8, 4  ;;  %s5605_s21 = sld [smem:[#allocation18_spill]]  ;;  %s5469_s12 = int_to_ptr.vmem [resolvable:$true] %s3231_s12 }
 0x1fb   : > { %3830 = vmatpush3.bf16.msra.mxu1 %v4209_v1  ;;  %v5183_v56 = vld [vmem:[#allocation2 + $0x4] sm:$0xf]  ;;  %v5185_v57 = vld [vmem:[#allocation2 + $0x8] sm:$0x1]  ;;  %v4219_v59 = vld [vmem:[#allocation2 + $0x18] sm:$0xff]   ;;  %v1180_v60 = vshrl.u32 %v5181_v55, 16 }
 0x1fc   : > { %3831 = vmatprep.subr.bf16.mxu1 %v4210_v39  ;;  %3758 = vmatpush3.bf16.msra.mxu0 %v4220_v0  ;;  %v1183_v62 = vshll.u32 %v5181_v55, 16  ;;  %v4221_v2 = vld [vmem:[#allocation8 + $0x108] sm:$0xff]   ;;  %v4231_v3 = vld [vmem:[#allocation2 + $0x24] sm:$0xff]   ;;  %v1189_v4 = vshll.u32 %v5183_v56, 16  ;;  %v1193_v5 = vshrl.u32 %v5183_v56, 16  ;;  %v1199_v6 = vshll.u32 %v5185_v57, 16  ;;  %vm5202_vm3 = vmor %vm1176_vm1, %vm1177_vm2 }
 0x1fd   : > { %3759 = vmatprep.subr.bf16.mxu0 %v4222_v44  ;;  %v1182_v8 = vrot.slane %v1180_v60, 4  ;;  %v4234_v11 = vld [vmem:[#allocation8 + $0x78] sm:$0xff]   ;;  %v5192_v42 = vld [vmem:[#allocation2 + $0xc] sm:$0xf]  ;;  %v5194_v24 = vld [vmem:[#allocation2 + $0x10] sm:$0xf] }
 0x1fe   : > { %v1185_v9 = vrot.slane %v1183_v62, 5  ;;  %v1191_v22 = vrot.slane %v1189_v4, 5  ;;  %v1195_v25 = vrot.slane %v1193_v5, 4  ;;  %v1201_v14 = vrot.slane %v1199_v6, 5  ;;  %v5196_v48 = vld [vmem:[#allocation2 + $0x14] sm:$0x1]  ;;  %vm5301_vm6 = vmor %vm1570_vm4, %vm1571_vm5 }
 0x1ff   : > { %3832 = vmatpush3.bf16.msra.mxu1 %v4210_v39  ;;  %v1204_v15 = vshrl.u32 %v5192_v42, 16  ;;  %v1207_v16 = vshll.u32 %v5192_v42, 16  ;;  %v4223_v17 = vld [vmem:[#allocation8 + $0x110] sm:$0xff]   ;;  %v1213_v58 = vshll.u32 %v5194_v24, 16  ;;  %v1217_v21 = vshrl.u32 %v5194_v24, 16  ;;  %v4236_v27 = vld [vmem:[#allocation8] sm:$0xff]  }
 0x200   : > { %3833 = vmatprep.subr.bf16.mxu1 %v4211_v10  ;;  %3760 = vmatpush3.bf16.msra.mxu0 %v4222_v44  ;;  %v1186_v19 = vor.u32 %v1185_v9, %v1182_v8  ;;  %v1196_v20 = vor.u32 %v1195_v25, %v1191_v22  ;;  %v1223_v23 = vshll.u32 %v5196_v48, 16  ;;  %v1926_v26 = vld [vmem:[#allocation2 + $0xc] sm:$0xf]  ;;  %v5209_v7 = vld [vmem:[#allocation2 + $0x10] sm:$0xf]  ;;  %v4225_v40 = vld [vmem:[#allocation8 + $0x118] sm:$0xff]  }
 0x201   : > { %3761 = vmatprep.subr.bf16.mxu0 %v4224_v47  ;;  %v1206_v28 = vrot.slane %v1204_v15, 4  ;;  %v1209_v13 = vrot.slane %v1207_v16, 5  ;;  %v4233_v29 = vld [vmem:[#allocation2 + $0x30] sm:$0xff]   ;;  %v1215_v30 = vrot.slane %v1213_v58, 5  ;;  %v1219_v46 = vrot.slane %v1217_v21, 4  ;;  %v4227_v60 = vld [vmem:[#allocation8 + $0x120] sm:$0xff]  }
 0x202   : > { %v1187_v63 = vrot.slane %v1186_v19, 4  ;;  %v1197_v41 = vrot.slane %v1196_v20, 4  ;;  %v1225_v31 = vrot.slane %v1223_v23, 5  ;;  %v5211_v32 = vld [vmem:[#allocation2 + $0x14] sm:$0x1]  ;;  %v1939_v35 = vshrl.u32 %v1926_v26, 16 }
 0x203   : > { %3834 = vmatpush3.bf16.msra.mxu1 %v4211_v10  ;;  %v1210_v34 = vor.u32 %v1209_v13, %v1206_v28  ;;  %v1942_v61 = vshll.u32 %v1926_v26, 16  ;;  %v1220_v37 = vor.u32 %v1219_v46, %v1215_v30  ;;  %v1948_v38 = vshll.u32 %v5209_v7, 16  ;;  %v1929_v39 = vld [vmem:[#allocation2 + $0x18] sm:$0xf]  ;;  %v5219_v10 = vld [vmem:[#allocation2 + $0x1c] sm:$0xf] }
 0x204   : > { %3835 = vmatprep.subr.bf16.mxu1 %v4212_v12  ;;  %3762 = vmatpush3.bf16.msra.mxu0 %v4224_v47  ;;  %v1192_v33 = vsel %vm5202_vm3, %v1187_v63, %v1191_v22  ;;  %v1202_v36 = vsel %vm5202_vm3, %v1197_v41, %v1201_v14  ;;  %v1952_v1 = vshrl.u32 %v5209_v7, 16  ;;  %v1941_v0 = vrot.slane %v1939_v35, 4  ;;  %v4229_v20 = vld [vmem:[#allocation8 + $0x128] sm:$0xff]   ;;  %v4240_v21 = vld [vmem:[#allocation8 + $0x10] sm:$0xff]   ;;  %s3552_s20 = sshll.u32 %s5604_s6, 5  ;;  %s5606_s15 = sld [smem:[#allocation25_spill]] }
 0x205   : > { %3763 = vmatprep.subr.bf16.mxu0 %v4226_v50  ;;  %v3418_v43 = vcombine.low %v1192_v33, %v1202_v36  ;;  %v1944_v44 = vrot.slane %v1942_v61, 5  ;;  %v1221_v47 = vrot.slane %v1220_v37, 4  ;;  %v1972_v4 = vshll.u32 %v5219_v10, 16  ;;  %v5237_v41 = vld [vmem:[#allocation2 + $0x18] sm:$0xf]  ;;  %v4289_v18 = vld [vmem:[#allocation8 + $0x228] sm:$0xff]   ;;  %s3228_s24 = sadd.s32 %s3592_s13, %s3552_s20 }
 0x206   : > { %v1976_v14 = vshrl.u32 %v5219_v10, 16  ;;  %v4232_v46 = vld [vmem:[#allocation8 + $0x130] sm:$0xff]   ;;  %v5243_v33 = vld [vmem:[#allocation2 + $0x20] sm:$0x1]  ;;  %v1231_v35 = vshll.u32 %v5237_v41, 16  ;;  %s3553_s30 = sshll.u32 %s3228_s24, 7 }
 0x207   : > { %3836 = vmatpush3.bf16.msra.mxu1 %v4212_v12  ;;  %v1211_v12 = vrot.slane %v1210_v34, 4  ;;  %3771 = vmatprep.mubr.bf16.mxu0 %v3418_v43  ;;  %v1226_v62 = vsel %vm5202_vm3, %v1221_v47, %v1225_v31  ;;  %v1974_v25 = vrot.slane %v1972_v4, 5  ;;  %v1228_v34 = vshrl.u32 %v5237_v41, 16  ;;  %v5250_v43 = vld [vmem:[#allocation2 + $0x24] sm:$0xf]  ;;  %s5476_s19 = scalar_lea.sflag [#allocation5], %s352_s2 }
 0x208   : > { %3837 = vmatprep.subr.bf16.mxu1 %v4213_v45  ;;  %3764 = vmatpush3.bf16.msra.mxu0 %v4226_v50  ;;  %v1954_v50 = vrot.slane %v1952_v1, 4  ;;  %v1978_v58 = vrot.slane %v1976_v14, 4  ;;  %v1247_v37 = vshll.u32 %v5243_v33, 16  ;;  %v5256_v47 = vld [vmem:[#allocation2 + $0x2c] sm:$0x1]  ;;  %p5607_p4 = scmp.ne.s32.totalorder %s5605_s21, 0 }
 0x209   : > { %3765 = vmatprep.subr.bf16.mxu0 %v4228_v52  ;;  %v1230_v1 = vrot.slane %v1228_v34, 4  ;;  %v4248_v34 = vld [vmem:[#allocation8 + $0x30] sm:$0xff]   ;;  %s4556_s4 = smov [#allocation11]  }
 0x20a   : > { %v1979_v28 = vor.u32 %v1978_v58, %v1974_v25  ;;  %v5270_v58 = vld [vmem:[#allocation2 + $0x2c] sm:$0x1]  ;;  %s4418_s14 = sshll.u32 %s4556_s4, 4  ;;  %s4419_s14 = int_to_ptr.vmem [resolvable:$false] %s4418_s14 }
 0x20b   : > { %3838 = vmatpush3.bf16.msra.mxu1 %v4213_v45  ;;  %v5221_v45 = vld [vmem:[#allocation2 + $0x20] sm:$0x1]  ;;  %p4421_p0 = scmp.lt.s32.totalorder %s5469_s12, %s4419_s14 }
 0x20c   : > { %3839 = vmatprep.subr.bf16.mxu1 %v4214_v49  ;;  %3766 = vmatpush3.bf16.msra.mxu0 %v4228_v52  ;;  %v1216_v52 = vsel %vm5202_vm3, %v1211_v12, %v1215_v30  ;;  %v1982_v19 = vshll.u32 %v5221_v45, 16  ;;  %v1980_v13 = vrot.slane %v1979_v28, 4  ;;  %v5239_v30 = vld [vmem:[#allocation2 + $0x1c] sm:$0xf] }
 0x20d   : > { %3767 = vmatprep.subr.bf16.mxu0 %v4230_v54  ;;  %v3419_v5 = vcombine.low %v1216_v52, %v1226_v62  ;;  %v1237_v61 = vshll.u32 %v5239_v30, 16  ;;  %v1241_v36 = vshrl.u32 %v5239_v30, 16  ;;  %v4246_v62 = vld [vmem:[#allocation8 + $0x28] sm:$0xff]  }
 0x20e   : > { %v1984_v63 = vrot.slane %v1982_v19, 5 }
 0x20f   : > { %3840 = vmatpush3.bf16.msra.mxu1 %v4214_v49  ;;  %v1950_v49 = vrot.slane %v1948_v38, 5  ;;  %v4244_v38 = vld [vmem:[#allocation8 + $0x20] sm:$0xff]  }
 0x210   : > { %3841 = vmatprep.subr.bf16.mxu1 %v4215_v51  ;;  %3768 = vmatpush3.bf16.msra.mxu0 %v4230_v54  ;;  %v1963_v54 = vshrl.u32 %v1929_v39, 16  ;;  %v1985_v31 = vsel %vm5202_vm3, %v1980_v13, %v1984_v63 }
 0x211   : > { %3769 = vmatprep.subr.bf16.mxu0 %v4234_v11 }
 0x212   : > { %v1965_v8 = vrot.slane %v1963_v54, 4  ;;  %v1255_v54 = vshll.u32 %v5250_v43, 16 }
 0x213   : > { %3842 = vmatpush3.bf16.msra.mxu1 %v4215_v51  ;;  %v1958_v51 = vshll.u32 %v5211_v32, 16 }
 0x214   : > { %3851 = vmatprep.subr.bf16.mxu1 %v4218_v53  ;;  %3770 = vmatpush3.bf16.msra.mxu0 %v4234_v11  ;;  %v4238_v11 = vld [vmem:[#allocation8 + $0x8] sm:$0xff]  }
 0x215   : > { %3779 = vmatprep.subr.bf16.mxu0 %v4236_v27 }
 0x216   : > { %3844 = vmatmul.mubr.bf16.vlgmr.msra.gmra.mrb[0].mxu1 %v4219_v59  ;;  %v1966_v59 = vshll.u32 %v1929_v39, 16  ;;  %v1233_v39 = vrot.slane %v1231_v35, 5 }
 0x217   : > { %3852 = vmatpush3.bf16.msra.mxu1 %v4218_v53  ;;  %3847 = vmatprep.mubr.bf16.mxu1 %v4231_v3  ;;  %v1945_v53 = vor.u32 %v1944_v44, %v1941_v0  ;;  %v1960_v3 = vrot.slane %v1958_v51, 5  ;;  %v1243_v0 = vrot.slane %v1241_v36, 4  ;;  %v5254_v44 = vld [vmem:[#allocation2 + $0x28] sm:$0xf]  ;;  %v4235_v51 = vld [vmem:[#allocation8 + $0x138] sm:$0xff]  }
 0x218   : > { %3853 = vmatprep.subr.bf16.mxu1 %v4221_v2  ;;  %v1968_v9 = vrot.slane %v1966_v59, 5  ;;  %3772 = vmatmul.mubr.bf16.vlgmr.msra.gmra.mrb[12].mxu0 %v3419_v5  ;;  %v1234_v52 = vor.u32 %v1233_v39, %v1230_v1  ;;  %v1261_v59 = vshll.u32 %v5254_v44, 16  ;;  %v1265_v4 = vshrl.u32 %v5254_v44, 16 }
 0x219   : > { %v1946_v6 = vrot.slane %v1945_v53, 4  ;;  %3780 = vmatpush3.bf16.msra.mxu0 %v4236_v27  ;;  %v4242_v27 = vld [vmem:[#allocation8 + $0x18] sm:$0xff]   ;;  %v1252_v53 = vshrl.u32 %v5250_v43, 16  ;;  %v1271_v5 = vshll.u32 %v5256_v47, 16 }
 0x21a   : > { %v1969_v16 = vor.u32 %v1968_v9, %v1965_v8  ;;  %3781 = vmatprep.subr.bf16.mxu0 %v4238_v11  ;;  %v4237_v8 = vld [vmem:[#allocation8 + $0x140] sm:$0xff]   ;;  %v1235_v9 = vrot.slane %v1234_v52, 4  ;;  %v1267_v19 = vrot.slane %v1265_v4, 4 }
 0x21b   : > { %3854 = vmatpush3.bf16.msra.mxu1 %v4221_v2  ;;  %v1955_v2 = vor.u32 %v1954_v50, %v1950_v49  ;;  %v1951_v15 = vsel %vm5202_vm3, %v1946_v6, %v1950_v49  ;;  %v3430_v49 = vcombine.low %v5181_v55, %v5183_v56  ;;  %v2206_v50 = vrot.slane %v5209_v7, 5  ;;  %v5266_v6 = vld [vmem:[#allocation2 + $0x28] sm:$0xf] }
 0x21c   : > { %3855 = vmatprep.subr.bf16.mxu1 %v4223_v17  ;;  %v1970_v26 = vrot.slane %v1969_v16, 4 }
 0x21d   : > { %v1956_v22 = vrot.slane %v1955_v2, 4  ;;  %3782 = vmatpush3.bf16.msra.mxu0 %v4238_v11  ;;  %v1254_v11 = vrot.slane %v1252_v53, 4 }
 0x21e   : > { %3848 = vmatmul.mubr.bf16.gmra.mrb[4].mxu1 %v4233_v29  ;;  %v1975_v29 = vsel %vm5202_vm3, %v1970_v26, %v1974_v25  ;;  %3783 = vmatprep.subr.bf16.mxu0 %v4240_v21  ;;  %v1263_v25 = vrot.slane %v1261_v59, 5  ;;  %v1935_v26 = vld [vmem:[#allocation2 + $0x30] sm:$0xf] }
 0x21f   : > { %3856 = vmatpush3.bf16.msra.mxu1 %v4223_v17  ;;  %v1961_v17 = vsel %vm5202_vm3, %v1956_v22, %v1960_v3  ;;  %v5252_v12 = vcombine.low %v1975_v29, %v1985_v31  ;;  %v1249_v3 = vrot.slane %v1247_v37, 5  ;;  %v1257_v22 = vrot.slane %v1255_v54, 5  ;;  %v5278_v37 = vld [vmem:[#allocation2 + $0x38] sm:$0x1] }
 0x220   : > { %3857 = vmatprep.subr.bf16.mxu1 %v4225_v40  ;;  %v3470_v23 = vcombine.low %v1951_v15, %v1961_v17  ;;  %v1273_v15 = vrot.slane %v1271_v5, 5  ;;  %v1268_v28 = vor.u32 %v1267_v19, %v1263_v25  ;;  %v2000_v29 = vshrl.u32 %v5266_v6, 16 }
 0x221   : > { %3784 = vmatpush3.bf16.msra.mxu0 %v4240_v21  ;;  %v1258_v17 = vor.u32 %v1257_v22, %v1254_v11  ;;  %v2014_v53 = vshll.u32 %v1935_v26, 16  ;;  %v2188_v11 = vld [vmem:[#allocation2 + $0xc] sm:$0xe]  ;;  %v2208_v22 = vrot.slane %v2206_v50, 4 }
 0x222   : > { %3867 = vmatprep.mubr.bf16.mxu1 %v3470_v23  ;;  %3785 = vmatprep.subr.bf16.mxu0 %v4242_v27  ;;  %v1996_v23 = vshll.u32 %v5266_v6, 16  ;;  %v1269_v1 = vrot.slane %v1268_v28, 4  ;;  %v2002_v39 = vrot.slane %v2000_v29, 4  ;;  %v4243_v28 = vld [vmem:[#allocation8 + $0x158] sm:$0xff]   ;;  %v4253_v29 = vld [vmem:[#allocation8 + $0x80] sm:$0xff]  }
 0x223   : > { %3858 = vmatpush3.bf16.msra.mxu1 %v4225_v40  ;;  %v1239_v40 = vrot.slane %v1237_v61, 5  ;;  %v1259_v35 = vrot.slane %v1258_v17, 4  ;;  %v2016_v5 = vrot.slane %v2014_v53, 5  ;;  %v2209_v17 = vrot.slane %v5211_v32, 5 }
 0x224   : > { %3859 = vmatprep.subr.bf16.mxu1 %v4227_v60  ;;  %v1998_v36 = vrot.slane %v1996_v23, 5  ;;  %v1274_v59 = vsel %vm5202_vm3, %v1269_v1, %v1273_v15  ;;  %v2030_v15 = vshll.u32 %v5278_v37, 16  ;;  %v3432_v1 = vcombine.low %v5237_v41, %v5239_v30  ;;  %v4249_v41 = vld [vmem:[#allocation8 + $0x170] sm:$0xff]  }
 0x225   : > { %v1244_v2 = vor.u32 %v1243_v0, %v1239_v40  ;;  %3786 = vmatpush3.bf16.msra.mxu0 %v4242_v27  ;;  %v5276_v27 = vld [vmem:[#allocation2 + $0x34] sm:$0xf]  ;;  %v2011_v0 = vshrl.u32 %v1935_v26, 16  ;;  %v1264_v52 = vsel %vm5202_vm3, %v1259_v35, %v1263_v25  ;;  %v4245_v35 = vld [vmem:[#allocation8 + $0x160] sm:$0xff]   ;;  %v3433_v53 = vcombine.low %v5250_v43, %v5254_v44  ;;  %v4298_v23 = vld [vmem:[#allocation9 + $0x30] sm:$0xff]  }
 0x226   : > { %3787 = vmatprep.subr.bf16.mxu0 %v4244_v38  ;;  %v2020_v54 = vshll.u32 %v5276_v27, 16  ;;  %v2024_v19 = vshrl.u32 %v5276_v27, 16 }
 0x227   : > { %3860 = vmatpush3.bf16.msra.mxu1 %v4227_v60  ;;  %v1932_v60 = vld [vmem:[#allocation2 + $0x24] sm:$0xf]  ;;  %v1245_v14 = vrot.slane %v1244_v2, 4  ;;  %v2013_v2 = vrot.slane %v2011_v0, 4  ;;  %v1575_v0 = vrot.slane %v5183_v56, 5  ;;  %v2220_v56 = vrot.slane %v5266_v6, 5 }
 0x228   : > { %3861 = vmatprep.subr.bf16.mxu1 %v4229_v20  ;;  %v1987_v16 = vshrl.u32 %v1932_v60, 16  ;;  %v1990_v21 = vshll.u32 %v1932_v60, 16  ;;  %v2003_v60 = vor.u32 %v2002_v39, %v1998_v36  ;;  %v2189_v39 = vld [vmem:[#allocation2 + $0x18] sm:$0xe] }
 0x229   : > { %v1250_v63 = vsel %vm5202_vm3, %v1245_v14, %v1249_v3  ;;  %3788 = vmatpush3.bf16.msra.mxu0 %v4244_v38  ;;  %v3421_v3 = vcombine.low %v1264_v52, %v1274_v59  ;;  %v2022_v14 = vrot.slane %v2020_v54, 5  ;;  %v1578_v52 = vrot.slane %v5185_v57, 5  ;;  %v1558_v57 = vld [vmem:[#allocation2] sm:$0xe] }
 0x22a   : > { %v1989_v13 = vrot.slane %v1987_v16, 4  ;;  %v1992_v61 = vrot.slane %v1990_v21, 5  ;;  %3789 = vmatprep.subr.bf16.mxu0 %v4246_v62  ;;  %v2004_v25 = vrot.slane %v2003_v60, 4  ;;  %v4241_v16 = vld [vmem:[#allocation8 + $0x150] sm:$0xff]   ;;  %v2026_v21 = vrot.slane %v2024_v19, 4  ;;  %v4260_v60 = vld [vmem:[#allocation8 + $0x98] sm:$0xff]  }
 0x22b   : > { %3862 = vmatpush3.bf16.msra.mxu1 %v4229_v20  ;;  %v1240_v20 = vsel %vm5202_vm3, %v1235_v9, %v1239_v40  ;;  %v2006_v40 = vshll.u32 %v5270_v58, 16  ;;  %v4250_v9 = vld [vmem:[#allocation8 + $0x38] sm:$0xff]   ;;  %v3483_v54 = vrot.slane %v2189_v39, 9  ;;  %v2213_v59 = vrot.slane %v5219_v10, 5 }
 0x22c   : > { %3863 = vmatprep.subr.bf16.mxu1 %v4232_v46  ;;  %v3420_v31 = vcombine.low %v1240_v20, %v1250_v63  ;;  %v1993_v38 = vor.u32 %v1992_v61, %v1989_v13  ;;  %v3482_v20 = vrot.slane %v2188_v11, 9  ;;  %v2027_v32 = vor.u32 %v2026_v21, %v2022_v14  ;;  %v4255_v21 = vld [vmem:[#allocation8 + $0x180] sm:$0xff]   ;;  %v1561_v39 = vld [vmem:[#allocation2 + $0x24] sm:$0xe] }
 0x22d   : > { %3790 = vmatpush3.bf16.msra.mxu0 %v4246_v62  ;;  %v2017_v62 = vor.u32 %v2016_v5, %v2013_v2  ;;  %v2032_v13 = vrot.slane %v2030_v15, 5  ;;  %v2190_v2 = vld [vmem:[#allocation2 + $0x24] sm:$0xe]  ;;  %v2215_v10 = vrot.slane %v2213_v59, 4  ;;  %v2216_v11 = vrot.slane %v5221_v45, 5 }
 0x22e   : > { %3775 = vmatprep.mubr.bf16.mxu0 %v3420_v31  ;;  %v1994_v4 = vrot.slane %v1993_v38, 4  ;;  %3791 = vmatprep.subr.bf16.mxu0 %v4248_v34  ;;  %v2207_v55 = vsel %vm5301_vm6, %v3482_v20, %v2206_v50  ;;  %v1585_v38 = vrot.slane %v5196_v48, 5  ;;  %v1582_v48 = vrot.slane %v5194_v24, 5 }
 0x22f   : > { %3864 = vmatpush3.bf16.msra.mxu1 %v4232_v46  ;;  %v4239_v46 = vld [vmem:[#allocation8 + $0x148] sm:$0xff]   ;;  %3776 = vmatmul.mubr.bf16.gmra.mrb[16].mxu0 %v3421_v3  ;;  %v2018_v63 = vrot.slane %v2017_v62, 4  ;;  %v1559_v3 = vld [vmem:[#allocation2 + $0xc] sm:$0xe]  ;;  %v2222_v45 = vrot.slane %v2220_v56, 4  ;;  %v2227_v20 = vrot.slane %v5276_v27, 5 }
 0x230   : > { %3865 = vmatprep.subr.bf16.mxu1 %v4235_v51  ;;  %3795 = vmatprep.mubr.bf16.mxu0 %v3430_v49  ;;  %v2210_v49 = vsel %vm5301_vm6, %v2208_v22, %v2209_v17  ;;  %v3443_v5 = vrot.slane %v1559_v3, 9  ;;  %v4262_v22 = vld [vmem:[#allocation8 + $0xa0] sm:$0xff]   ;;  %v4264_v62 = vld [vmem:[#allocation8 + $0xa8] sm:$0xff]   ;;  %v2214_v17 = vsel %vm5301_vm6, %v3483_v54, %v2213_v59  ;;  %v2230_v27 = vrot.slane %v5278_v37, 5  ;;  %v4269_v3 = vld [vmem:[#allocation8 + $0x1b0] sm:$0xff]  }
 0x231   : > { %3792 = vmatpush3.bf16.msra.mxu0 %v4248_v34  ;;  %v2023_v31 = vsel %vm5202_vm3, %v2018_v63, %v2022_v14  ;;  %v2028_v34 = vrot.slane %v2027_v32, 4  ;;  %v3486_v7 = vcombine.low %v2207_v55, %v2210_v49  ;;  %v2223_v14 = vrot.slane %v5270_v58, 5  ;;  %v4257_v32 = vld [vmem:[#allocation8 + $0x188] sm:$0xff]  }
 0x232   : > { %3793 = vmatprep.subr.bf16.mxu0 %v4250_v9  ;;  %v2217_v58 = vsel %vm5301_vm6, %v2215_v10, %v2216_v11  ;;  %v2229_v55 = vrot.slane %v2227_v20, 4  ;;  %v1589_v49 = vrot.slane %v5239_v30, 5  ;;  %v1592_v30 = vrot.slane %v5243_v33, 5 }
 0x233   : > { %3866 = vmatpush3.bf16.msra.mxu1 %v4235_v51  ;;  %v2008_v51 = vrot.slane %v2006_v40, 5  ;;  %v2033_v61 = vsel %vm5202_vm3, %v2028_v34, %v2032_v13  ;;  %v4247_v40 = vld [vmem:[#allocation8 + $0x168] sm:$0xff]   ;;  %v2224_v63 = vsel %vm5301_vm6, %v2222_v45, %v2223_v14  ;;  %v4268_v13 = vld [vmem:[#allocation8 + $0xb0] sm:$0xff]   ;;  %v3445_v33 = vrot.slane %v1561_v39, 9 }
 0x234   : > { %3875 = vmatprep.subr.bf16.mxu1 %v4237_v8  ;;  %v3473_v50 = vcombine.low %v2023_v31, %v2033_v61  ;;  %v1560_v34 = vld [vmem:[#allocation2 + $0x18] sm:$0xe]  ;;  %v2566_v39 = vld [vmem:[#allocation2 + $0x3c] sm:$0xf] }
 0x235   : > { %3794 = vmatpush3.bf16.msra.mxu0 %v4250_v9  ;;  %v1584_v9 = vrot.slane %v1582_v48, 4  ;;  %v3444_v61 = vrot.slane %v1560_v34, 9 }
 0x236   : > { %3868 = vmatmul.mubr.bf16.vlgmr.msra.gmra.mrb[0].mxu1 %v5252_v12  ;;  %v1999_v12 = vsel %vm5202_vm3, %v1994_v4, %v1998_v36  ;;  %3803 = vmatprep.subr.bf16.mxu0 %v4253_v29  ;;  %v4256_v36 = vld [vmem:[#allocation8 + $0x88] sm:$0xff]   ;;  %v3442_v4 = vrot.slane %v1558_v57, 9 }
 0x237   : > { %3876 = vmatpush3.bf16.msra.mxu1 %v4237_v8  ;;  %v2009_v8 = vsel %vm5202_vm3, %v2004_v25, %v2008_v51  ;;  %v1577_v51 = vrot.slane %v1575_v0, 4  ;;  %v4251_v25 = vld [vmem:[#allocation8 + $0x178] sm:$0xff]   ;;  %v5339_v15 = vsel %vm5301_vm6, %v1584_v9, %v1585_v38 }
 0x238   : > { %3877 = vmatprep.subr.bf16.mxu1 %v4239_v46  ;;  %v3472_v26 = vcombine.low %v1999_v12, %v2009_v8  ;;  %v1576_v6 = vsel %vm5301_vm6, %v3442_v4, %v1575_v0  ;;  %v2191_v8 = vld [vmem:[#allocation2 + $0x30] sm:$0xe] }
 0x239   : > { %v1579_v43 = vsel %vm5301_vm6, %v1577_v51, %v1578_v52  ;;  %v4261_v52 = vld [vmem:[#allocation8 + $0x198] sm:$0xff]   ;;  %v2557_v51 = vld [vmem:[#allocation2 + $0x18] sm:$0xf] }
 0x23a   : > { %3871 = vmatprep.mubr.bf16.mxu1 %v3472_v26  ;;  %v3446_v19 = vcombine.low %v1576_v6, %v1579_v43  ;;  %v2573_v57 = vshll.u32 %v2557_v51, 16  ;;  %v4271_v43 = vld [vmem:[#allocation8 + $0x1b8] sm:$0xff]   ;;  %v4273_v6 = vld [vmem:[#allocation8 + $0x1c0] sm:$0xff]  }
 0x23b   : > { %3878 = vmatpush3.bf16.msra.mxu1 %v4239_v46  ;;  %v3431_v46 = vcombine.low %v5192_v42, %v5194_v24  ;;  %v4258_v42 = vld [vmem:[#allocation8 + $0x90] sm:$0xff]   ;;  %v5334_v24 = vsel %vm5301_vm6, %v3443_v5, %v1582_v48 }
 0x23c   : > { %3879 = vmatprep.subr.bf16.mxu1 %v4241_v16  ;;  %v3447_v12 = vcombine.low %v5334_v24, %v5339_v15  ;;  %v2575_v10 = vrot.slane %v2573_v57, 5  ;;  %v4280_v15 = vld [vmem:[#allocation2 + $0x30] sm:$0xff]  }
 0x23d   : > { %3796 = vmatmul.mubr.bf16.vlgmr.msra.gmra.mrb[12].mxu0 %v3431_v46  ;;  %v2231_v46 = vsel %vm5301_vm6, %v2229_v55, %v2230_v27  ;;  %v4277_v27 = vld [vmem:[#allocation8 + $0x1d8] sm:$0xff]  }
 0x23e   : > { %3872 = vmatmul.mubr.bf16.gmra.mrb[4].mxu1 %v3473_v50  ;;  %3804 = vmatpush3.bf16.msra.mxu0 %v4253_v29  ;;  %v3485_v29 = vrot.slane %v2191_v8, 9  ;;  %v4259_v50 = vld [vmem:[#allocation8 + $0x190] sm:$0xff]  }
 0x23f   : > { %3880 = vmatpush3.bf16.msra.mxu1 %v4241_v16  ;;  %3891 = vmatprep.mubr.bf16.mxu1 %v3486_v7  ;;  %v3484_v16 = vrot.slane %v2190_v2, 9  ;;  %v1591_v7 = vrot.slane %v1589_v49, 4  ;;  %v5369_v2 = vld [vmem:[#allocation2 + $0x1c] sm:$0xf] }
 0x240   : > { %3881 = vmatprep.subr.bf16.mxu1 %v4243_v28  ;;  %3805 = vmatprep.subr.bf16.mxu0 %v4256_v36  ;;  %v2228_v37 = vsel %vm5301_vm6, %v3485_v29, %v2227_v20  ;;  %v2579_v48 = vshll.u32 %v5369_v2, 16  ;;  %v2583_v4 = vshrl.u32 %v5369_v2, 16  ;;  %v4276_v20 = vld [vmem:[#allocation8 + $0x1d0] sm:$0xff]  }
 0x241   : > { %3799 = vmatprep.mubr.bf16.mxu0 %v3432_v1  ;;  %v2221_v26 = vsel %vm5301_vm6, %v3484_v16, %v2220_v56  ;;  %v3489_v1 = vcombine.low %v2228_v37, %v2231_v46  ;;  %v1593_v0 = vsel %vm5301_vm6, %v1591_v7, %v1592_v30  ;;  %v2570_v56 = vshrl.u32 %v2557_v51, 16  ;;  %v4275_v16 = vld [vmem:[#allocation8 + $0x1c8] sm:$0xff]   ;;  %v4282_v8 = vld [vmem:[#allocation2 + $0x3c] sm:$0xff]  }
 0x242   : > { %3806 = vmatpush3.bf16.msra.mxu0 %v4256_v36  ;;  %v3488_v31 = vcombine.low %v2221_v26, %v2224_v63  ;;  %v1596_v36 = vrot.slane %v5254_v44, 5  ;;  %v2581_v9 = vrot.slane %v2579_v48, 5  ;;  %v2585_v11 = vrot.slane %v2583_v4, 4  ;;  %v2560_v26 = vld [vmem:[#allocation2 + $0x24] sm:$0xf] }
 0x243   : > { %3882 = vmatpush3.bf16.msra.mxu1 %v4243_v28  ;;  %3807 = vmatprep.subr.bf16.mxu0 %v4258_v42  ;;  %v3487_v28 = vcombine.low %v2214_v17, %v2217_v58  ;;  %v2572_v5 = vrot.slane %v2570_v56, 4  ;;  %v5380_v63 = vld [vmem:[#allocation2 + $0x28] sm:$0xf]  ;;  %v2597_v29 = vshll.u32 %v2560_v26, 16 }
 0x244   : > { %3883 = vmatprep.subr.bf16.mxu1 %v4245_v35  ;;  %v1598_v38 = vrot.slane %v1596_v36, 4  ;;  %v1597_v54 = vsel %vm5301_vm6, %v3445_v33, %v1596_v36  ;;  %v2603_v55 = vshll.u32 %v5380_v63, 16  ;;  %v4279_v36 = vld [vmem:[#allocation8 + $0x1e8] sm:$0xff]   ;;  %v5390_v33 = vld [vmem:[#allocation2 + $0x40] sm:$0xf] }
 0x245   : > { %3800 = vmatmul.mubr.bf16.gmra.mrb[16].mxu0 %v3433_v53  ;;  %v1599_v53 = vrot.slane %v5256_v47, 5  ;;  %v2576_v24 = vor.u32 %v2575_v10, %v2572_v5  ;;  %v2599_v7 = vrot.slane %v2597_v29, 5  ;;  %v2655_v51 = vshrl.u32 %v5390_v33, 16 }
 0x246   : > { %3808 = vmatpush3.bf16.msra.mxu0 %v4258_v42  ;;  %3819 = vmatprep.mubr.bf16.mxu0 %v3446_v19  ;;  %v4272_v42 = vld [vmem:[#allocation2 + $0x18] sm:$0xff]   ;;  %v4274_v19 = vld [vmem:[#allocation2 + $0x24] sm:$0xff]   ;;  %v2605_v30 = vrot.slane %v2603_v55, 5  ;;  %v4285_v55 = vld [vmem:[#allocation8 + $0x208] sm:$0xff]  }
 0x247   : > { %3884 = vmatpush3.bf16.msra.mxu1 %v4245_v35  ;;  %3809 = vmatprep.subr.bf16.mxu0 %v4260_v60  ;;  %v4270_v35 = vld [vmem:[#allocation8 + $0xb8] sm:$0xff]   ;;  %v1600_v59 = vsel %vm5301_vm6, %v1598_v38, %v1599_v53  ;;  %v2577_v45 = vrot.slane %v2576_v24, 4  ;;  %v5392_v38 = vld [vmem:[#allocation2 + $0x38] sm:$0x1] }
 0x248   : > { %3885 = vmatprep.subr.bf16.mxu1 %v4247_v40  ;;  %v3449_v47 = vcombine.low %v1597_v54, %v1600_v59  ;;  %v2642_v54 = vshrl.u32 %v2566_v39, 16  ;;  %v2645_v59 = vshll.u32 %v2566_v39, 16  ;;  %v4290_v39 = vld [vmem:[#allocation8 + $0x230] sm:$0xff]  }
 0x249   : > { %v2582_v17 = vsel %vm5202_vm3, %v2577_v45, %v2581_v9 }
 0x24a   : > { %3810 = vmatpush3.bf16.msra.mxu0 %v4260_v60  ;;  %v4265_v60 = vld [vmem:[#allocation8 + $0x1a8] sm:$0xff]   ;;  %v2644_v5 = vrot.slane %v2642_v54, 4  ;;  %v2647_v10 = vrot.slane %v2645_v59, 5 }
 0x24b   : > { %3886 = vmatpush3.bf16.msra.mxu1 %v4247_v40  ;;  %3811 = vmatprep.subr.bf16.mxu0 %v4262_v22  ;;  %v1590_v40 = vsel %vm5301_vm6, %v3444_v61, %v1589_v49  ;;  %v2607_v49 = vshrl.u32 %v5380_v63, 16 }
 0x24c   : > { %3887 = vmatprep.subr.bf16.mxu1 %v4249_v41  ;;  %v3448_v44 = vcombine.low %v1590_v40, %v1593_v0  ;;  %v2648_v45 = vor.u32 %v2647_v10, %v2644_v5  ;;  %v4292_v10 = vld [vmem:[#allocation9] sm:$0xff]  }
 0x24e   : > { %3812 = vmatpush3.bf16.msra.mxu0 %v4262_v22  ;;  %v5373_v22 = vld [vmem:[#allocation2 + $0x20] sm:$0x1] }
 0x24f   : > { %3888 = vmatpush3.bf16.msra.mxu1 %v4249_v41  ;;  %3813 = vmatprep.subr.bf16.mxu0 %v4264_v62  ;;  %v4263_v41 = vld [vmem:[#allocation8 + $0x1a0] sm:$0xff]   ;;  %v2589_v14 = vshll.u32 %v5373_v22, 16 }
 0x250   : > { %3889 = vmatprep.subr.bf16.mxu1 %v4251_v25 }
 0x252   : > { %3814 = vmatpush3.bf16.msra.mxu0 %v4264_v62  ;;  %v2591_v62 = vrot.slane %v2589_v14, 5 }
 0x253   : > { %3890 = vmatpush3.bf16.msra.mxu1 %v4251_v25  ;;  %3815 = vmatprep.subr.bf16.mxu0 %v4268_v13  ;;  %v2586_v25 = vor.u32 %v2585_v11, %v2581_v9  ;;  %v2657_v11 = vrot.slane %v2655_v51, 4 }
 0x254   : > { %3899 = vmatprep.subr.bf16.mxu1 %v4255_v21 }
 0x256   : > { %3892 = vmatmul.mubr.bf16.vlgmr.msra.gmra.mrb[0].mxu1 %v3487_v28  ;;  %3816 = vmatpush3.bf16.msra.mxu0 %v4268_v13  ;;  %v2563_v28 = vld [vmem:[#allocation2 + $0x30] sm:$0xf]  ;;  %v2594_v13 = vshrl.u32 %v2560_v26, 16 }
 0x257   : > { %3900 = vmatpush3.bf16.msra.mxu1 %v4255_v21  ;;  %3895 = vmatprep.mubr.bf16.mxu1 %v3488_v31  ;;  %v4278_v31 = vld [vmem:[#allocation8 + $0x1e0] sm:$0xff]   ;;  %v2618_v34 = vshrl.u32 %v2563_v28, 16  ;;  %v2621_v46 = vshll.u32 %v2563_v28, 16  ;;  %v2649_v28 = vrot.slane %v2648_v45, 4 }
 0x258   : > { %3901 = vmatprep.subr.bf16.mxu1 %v4257_v32  ;;  %3817 = vmatprep.subr.bf16.mxu0 %v4270_v35  ;;  %v2596_v61 = vrot.slane %v2594_v13, 4 }
 0x259   : > { %v2623_v40 = vrot.slane %v2621_v46, 5 }
 0x25a   : > { %3818 = vmatpush3.bf16.msra.mxu0 %v4270_v35  ;;  %v2600_v53 = vor.u32 %v2599_v7, %v2596_v61 }
 0x25b   : > { %3902 = vmatpush3.bf16.msra.mxu1 %v4257_v32  ;;  %v5382_v32 = vld [vmem:[#allocation2 + $0x34] sm:$0xf]  ;;  %3971 = vmatprep.subr.bf16.mxu0 %v4292_v10 }
 0x25c   : > { %3903 = vmatprep.subr.bf16.mxu1 %v4259_v50  ;;  %v2627_v37 = vshll.u32 %v5382_v32, 16  ;;  %v2631_v35 = vshrl.u32 %v5382_v32, 16  ;;  %v2601_v48 = vrot.slane %v2600_v53, 4 }
 0x25d   : > { %3820 = vmatmul.mubr.bf16.vlgmr.msra.gmra.mrb[12].mxu0 %v3447_v12  ;;  %v2587_v12 = vrot.slane %v2586_v25, 4 }
 0x25e   : > { %3896 = vmatmul.mubr.bf16.gmra.mrb[4].mxu1 %v3489_v1  ;;  %3823 = vmatprep.mubr.bf16.mxu0 %v3448_v44  ;;  %v5388_v1 = vld [vmem:[#allocation2 + $0x2c] sm:$0x1]  ;;  %v2629_v0 = vrot.slane %v2627_v37, 5  ;;  %v4286_v37 = vld [vmem:[#allocation8 + $0x210] sm:$0xff]  }
 0x25f   : > { %3904 = vmatpush3.bf16.msra.mxu1 %v4259_v50  ;;  %3915 = vmatprep.mubr.bf16.mxu1 %v4272_v42  ;;  %v2592_v58 = vsel %vm5202_vm3, %v2587_v12, %v2591_v62  ;;  %v2609_v50 = vrot.slane %v2607_v49, 4  ;;  %v2620_v42 = vrot.slane %v2618_v34, 4  ;;  %v2840_v34 = vrot.slane %v5373_v22, 5 }
 0x260   : > { %3905 = vmatprep.subr.bf16.mxu1 %v4261_v52  ;;  %v3510_v21 = vcombine.low %v2582_v17, %v2592_v58  ;;  %3972 = vmatpush3.bf16.msra.mxu0 %v4292_v10 }
 0x261   : > { %v2610_v44 = vor.u32 %v2609_v50, %v2605_v30  ;;  %v2624_v56 = vor.u32 %v2623_v40, %v2620_v42  ;;  %v4288_v50 = vld [vmem:[#allocation8 + $0x220] sm:$0xff]   ;;  %v2820_v42 = vld [vmem:[#allocation2 + $0x24] sm:$0xe]  ;;  %v2851_v40 = vrot.slane %v5382_v32, 5  ;;  %v2858_v32 = vrot.slane %v5390_v33, 5 }
 0x263   : > { %3906 = vmatpush3.bf16.msra.mxu1 %v4261_v52  ;;  %v2633_v52 = vrot.slane %v2631_v35, 4  ;;  %v2611_v4 = vrot.slane %v2610_v44, 4  ;;  %v2625_v24 = vrot.slane %v2624_v56, 4  ;;  %v2847_v44 = vrot.slane %v5388_v1, 5  ;;  %v2822_v56 = vld [vmem:[#allocation2 + $0x3c] sm:$0xe] }
 0x264   : > { %3907 = vmatprep.subr.bf16.mxu1 %v4263_v41  ;;  %v2853_v59 = vrot.slane %v2851_v40, 4 }
 0x265   : > { %3824 = vmatmul.mubr.bf16.gmra.mrb[16].mxu0 %v3449_v47  ;;  %v4281_v47 = vld [vmem:[#allocation8 + $0x1f0] sm:$0xff]   ;;  %v2634_v57 = vor.u32 %v2633_v52, %v2629_v0  ;;  %v2630_v17 = vsel %vm5202_vm3, %v2625_v24, %v2629_v0  ;;  %v2821_v0 = vld [vmem:[#allocation2 + $0x30] sm:$0xe]  ;;  %v3523_v52 = vrot.slane %v2820_v42, 9  ;;  %v4296_v24 = vld [vmem:[#allocation9 + $0x20] sm:$0xff]  }
 0x266   : > { %v3524_v54 = vrot.slane %v2821_v0, 9 }
 0x267   : > { %3908 = vmatpush3.bf16.msra.mxu1 %v4263_v41  ;;  %v2613_v41 = vshll.u32 %v5388_v1, 16  ;;  %v2635_v25 = vrot.slane %v2634_v57, 4 }
 0x268   : > { %3909 = vmatprep.subr.bf16.mxu1 %v4265_v60 }
 0x26b   : > { %3910 = vmatpush3.bf16.msra.mxu1 %v4265_v60  ;;  %v2651_v60 = vshll.u32 %v5390_v33, 16 }
 0x26c   : > { %3911 = vmatprep.subr.bf16.mxu1 %v4269_v3 }
 0x26d   : > { %v2653_v9 = vrot.slane %v2651_v60, 5  ;;  %v2854_v60 = vrot.slane %v5392_v38, 5 }
 0x26f   : > { %3912 = vmatpush3.bf16.msra.mxu1 %v4269_v3  ;;  %v2637_v3 = vshll.u32 %v5392_v38, 16  ;;  %v2658_v12 = vor.u32 %v2657_v11, %v2653_v9  ;;  %v2654_v46 = vsel %vm5202_vm3, %v2649_v28, %v2653_v9  ;;  %v2855_v1 = vsel %vm5301_vm6, %v2853_v59, %v2854_v60  ;;  %v4293_v9 = vld [vmem:[#allocation9 + $0x8] sm:$0xff]   ;;  %v4294_v11 = vld [vmem:[#allocation9 + $0x10] sm:$0xff]  }
 0x270   : > { %3913 = vmatprep.subr.bf16.mxu1 %v4271_v43  ;;  %3973 = vmatprep.subr.bf16.mxu0 %v4293_v9 }
 0x271   : > { %v2639_v14 = vrot.slane %v2637_v3, 5  ;;  %v2659_v13 = vrot.slane %v2658_v12, 4  ;;  %v3525_v3 = vrot.slane %v2822_v56, 9  ;;  %3974 = vmatpush3.bf16.msra.mxu0 %v4293_v9  ;;  %v3184_v56 = vld [vmem:[%s5443_s16 + $0x10] sm:$0xff]  ;;  %v3183_v9 = vld [vmem:[%s5443_s16 + $0x8] sm:$0xff] }
 0x272   : > { %3975 = vmatprep.subr.bf16.mxu0 %v4294_v11 }
 0x273   : > { %3914 = vmatpush3.bf16.msra.mxu1 %v4271_v43  ;;  %v2615_v43 = vrot.slane %v2613_v41, 5  ;;  %v2640_v58 = vsel %vm5202_vm3, %v2635_v25, %v2639_v14  ;;  %v4291_v41 = vld [vmem:[#allocation8 + $0x238] sm:$0xff]   ;;  %v2859_v33 = vsel %vm5301_vm6, %v3525_v3, %v2858_v32  ;;  %v4297_v25 = vld [vmem:[#allocation9 + $0x28] sm:$0xff]  }
 0x274   : > { %3923 = vmatprep.subr.bf16.mxu1 %v4273_v6  ;;  %v4299_v14 = vld [vmem:[#allocation9 + $0x38] sm:$0xff]  }
 0x275   : > { %3976 = vmatpush3.bf16.msra.mxu0 %v4294_v11  ;;  %v3182_v3 = vld [vmem:[%s5443_s16] sm:$0xff] }
 0x276   : > { %3916 = vmatmul.mubr.bf16.vlgmr.msra.gmra.mrb[0].mxu1 %v4274_v19  ;;  %v5398_v19 = vld [vmem:[#allocation2 + $0x44] sm:$0x1] }
 0x277   : > { %3924 = vmatpush3.bf16.msra.mxu1 %v4273_v6  ;;  %3919 = vmatprep.mubr.bf16.mxu1 %v4280_v15  ;;  %v4283_v6 = vld [vmem:[#allocation8 + $0x1f8] sm:$0xff]   ;;  %v2606_v15 = vsel %vm5202_vm3, %v2601_v48, %v2605_v30  ;;  %v2661_v62 = vshll.u32 %v5398_v19, 16  ;;  %v2860_v48 = vrot.slane %v2858_v32, 4 }
 0x278   : > { %3925 = vmatprep.subr.bf16.mxu1 %v4275_v16  ;;  %v4287_v30 = vld [vmem:[#allocation8 + $0x218] sm:$0xff]  }
 0x279   : > { %v2663_v29 = vrot.slane %v2661_v62, 5 }
 0x27b   : > { %3926 = vmatpush3.bf16.msra.mxu1 %v4275_v16  ;;  %v2616_v16 = vsel %vm5202_vm3, %v2611_v4, %v2615_v43  ;;  %v2861_v4 = vrot.slane %v5398_v19, 5 }
 0x27c   : > { %3927 = vmatprep.subr.bf16.mxu1 %v4276_v20  ;;  %v3511_v26 = vcombine.low %v2606_v15, %v2616_v16 }
 0x27d   : > { %v2862_v43 = vsel %vm5301_vm6, %v2860_v48, %v2861_v4 }
 0x27e   : > { %3920 = vmatmul.mubr.bf16.gmra.mrb[4].mxu1 %v4282_v8  ;;  %v2837_v8 = vrot.slane %v5369_v2, 5  ;;  %v2664_v2 = vsel %vm5202_vm3, %v2659_v13, %v2663_v29  ;;  %v3529_v5 = vcombine.low %v2859_v33, %v2862_v43  ;;  %v3185_v33 = vld [vmem:[%s5443_s16 + $0x18] sm:$0xff] }
 0x27f   : > { %3928 = vmatpush3.bf16.msra.mxu1 %v4276_v20  ;;  %3939 = vmatprep.mubr.bf16.mxu1 %v3510_v21  ;;  %v4284_v20 = vld [vmem:[#allocation8 + $0x200] sm:$0xff]   ;;  %v2819_v21 = vld [vmem:[#allocation2 + $0x18] sm:$0xe]  ;;  %v3513_v7 = vcombine.low %v2654_v46, %v2664_v2 }
 0x280   : > { %3929 = vmatprep.subr.bf16.mxu1 %v4277_v27  ;;  %v3522_v49 = vrot.slane %v2819_v21, 9 }
 0x282   : > { %v2838_v35 = vsel %vm5301_vm6, %v3522_v49, %v2837_v8 }
 0x283   : > { %3930 = vmatpush3.bf16.msra.mxu1 %v4277_v27  ;;  %v3512_v27 = vcombine.low %v2630_v17, %v2640_v58 }
 0x284   : > { %3931 = vmatprep.subr.bf16.mxu1 %v4278_v31 }
 0x287   : > { %3932 = vmatpush3.bf16.msra.mxu1 %v4278_v31  ;;  %v2839_v31 = vrot.slane %v2837_v8, 4  ;;  %v3538_v8 = vld [vmem:[%s5602_s18] ss:$0 sm:$0xff]  ;;  %s5467_s18 = scalar_lea.hbm %s5606_s15, %s3553_s30 }
 0x288   : > { %3933 = vmatprep.subr.bf16.mxu1 %v4279_v36 }
 0x289   : > { %v2841_v61 = vsel %vm5301_vm6, %v2839_v31, %v2840_v34 }
 0x28a   : > { %v3526_v22 = vcombine.low %v2838_v35, %v2841_v61 }
 0x28b   : > { %3934 = vmatpush3.bf16.msra.mxu1 %v4279_v36  ;;  %v2844_v36 = vrot.slane %v5380_v63, 5 }
 0x28c   : > { %3935 = vmatprep.subr.bf16.mxu1 %v4281_v47 }
 0x28d   : > { %v2846_v53 = vrot.slane %v2844_v36, 4  ;;  %v2845_v63 = vsel %vm5301_vm6, %v3523_v52, %v2844_v36 }
 0x28f   : > { %3936 = vmatpush3.bf16.msra.mxu1 %v4281_v47  ;;  %v2848_v51 = vsel %vm5301_vm6, %v2846_v53, %v2847_v44  ;;  %v2852_v47 = vsel %vm5301_vm6, %v3524_v54, %v2851_v40 }
 0x290   : > { %3937 = vmatprep.subr.bf16.mxu1 %v4283_v6  ;;  %v3527_v57 = vcombine.low %v2845_v63, %v2848_v51  ;;  %v3528_v38 = vcombine.low %v2852_v47, %v2855_v1  ;;  %v3539_v47 = vld [vmem:[%s5603_s5] ss:$0 sm:$0xff]  ;;  %s4420_s5 = scalar_lea.vmem %s4419_s14, 2048 }
 0x293   : > { %3938 = vmatpush3.bf16.msra.mxu1 %v4283_v6  ;;  %v4295_v6 = vld [vmem:[#allocation9 + $0x18] sm:$0xff]  }
 0x294   : > { %3947 = vmatprep.subr.bf16.mxu1 %v4284_v20  ;;  %3977 = vmatprep.subr.bf16.mxu0 %v4295_v6 }
 0x295   : > { %3978 = vmatpush3.bf16.msra.mxu0 %v4295_v6 }
 0x296   : > { %3940 = vmatmul.mubr.bf16.vlgmr.msra.gmra.mrb[0].mxu1 %v3511_v26  ;;  %3979 = vmatprep.subr.bf16.mxu0 %v4296_v24 }
 0x297   : > { %3948 = vmatpush3.bf16.msra.mxu1 %v4284_v20  ;;  %3943 = vmatprep.mubr.bf16.mxu1 %v3512_v27 }
 0x298   : > { %3949 = vmatprep.subr.bf16.mxu1 %v4285_v55 }
 0x299   : > { %3980 = vmatpush3.bf16.msra.mxu0 %v4296_v24 }
 0x29a   : > { %3981 = vmatprep.subr.bf16.mxu0 %v4297_v25 }
 0x29b   : > { %3950 = vmatpush3.bf16.msra.mxu1 %v4285_v55 }
 0x29c   : > { %3951 = vmatprep.subr.bf16.mxu1 %v4286_v37 }
 0x29d   : > { %3982 = vmatpush3.bf16.msra.mxu0 %v4297_v25 }
 0x29e   : > { %3944 = vmatmul.mubr.bf16.gmra.mrb[4].mxu1 %v3513_v7  ;;  %3983 = vmatprep.subr.bf16.mxu0 %v4298_v23 }
 0x29f   : > { %3952 = vmatpush3.bf16.msra.mxu1 %v4286_v37  ;;  %3963 = vmatprep.mubr.bf16.mxu1 %v3526_v22 }
 0x2a0   : > { %3953 = vmatprep.subr.bf16.mxu1 %v4287_v30 }
 0x2a1   : > { %3984 = vmatpush3.bf16.msra.mxu0 %v4298_v23 }
 0x2a2   : > { %3985 = vmatprep.subr.bf16.mxu0 %v4299_v14 }
 0x2a3   : > { %3954 = vmatpush3.bf16.msra.mxu1 %v4287_v30 }
 0x2a4   : > { %3955 = vmatprep.subr.bf16.mxu1 %v4288_v50 }
 0x2a5   : > { %3986 = vmatpush3.bf16.msra.mxu0 %v4299_v14 }
 0x2a7   : > { %3956 = vmatpush3.bf16.msra.mxu1 %v4288_v50 }
 0x2a8   : > { %3957 = vmatprep.subr.bf16.mxu1 %v4289_v18 }
 0x2ab   : > { %3958 = vmatpush3.bf16.msra.mxu1 %v4289_v18 }
 0x2ac   : > { %3959 = vmatprep.subr.bf16.mxu1 %v4290_v39 }
 0x2af   : > { %3960 = vmatpush3.bf16.msra.mxu1 %v4290_v39 }
 0x2b0   : > { %3961 = vmatprep.subr.bf16.mxu1 %v4291_v41 }
 0x2b3   : > { %3962 = vmatpush3.bf16.msra.mxu1 %v4291_v41 }
 0x2b6   : > { %3964 = vmatmul.mubr.bf16.vlgmr.msra.gmra.mrb[0].mxu1 %v3527_v57 }
 0x2b7   : > { %3967 = vmatprep.mubr.bf16.mxu1 %v3528_v38 }
 0x2be   : > { %3968 = vmatmul.mubr.bf16.gmra.mrb[4].mxu1 %v3529_v5 }
 0x330   : > { %v3821_v19 = vpop.f32.mrb[12].mxu0 }
 0x331   : > { %v1716_v15 = vpop.f32.mrb[13].mxu0 }
 0x332   : > { %v3822_v16 = vpop.f32.mrb[14].mxu0 }
 0x333   : > { %v1719_v45 = vpop.f32.mrb[15].mxu0 }
 0x338   : > { %v3825_v12 = vpop.f32.mrb[16].mxu0 }
 0x339   : > { %v1732_v62 = vpop.f32.mrb[17].mxu0 }
 0x33a   : > { %v3826_v20 = vpop.f32.mrb[18].mxu0 }
 0x33b   : > { %v1735_v17 = vpop.f32.mrb[19].mxu0 }
 0x389   : > { %v3965_v58 = vpop.f32.mrb[0].mxu1 }
 0x38a   : > { %v3995_v21 = vadd.f32 %v3965_v58, %v3821_v19  ;;  %v2978_v26 = vpop.f32.mrb[1].mxu1 }
 0x38b   : > { %v3996_v27 = vadd.f32 %v2978_v26, %v1716_v15  ;;  %v3966_v28 = vpop.f32.mrb[2].mxu1 }
 0x38c   : > { %v3026_v13 = vadd.f32 %v3995_v21, %v3538_v8  ;;  %v3997_v29 = vadd.f32 %v3966_v28, %v3822_v16  ;;  %v2981_v55 = vpop.f32.mrb[3].mxu1  ;;  %v3187_v28 = vld [vmem:[%s5443_s16 + $0x28] sm:$0xff] }
 0x38d   : > { %v3024_v49 = vadd.f32 %v3996_v27, %v3538_v8  ;;  %v3998_v31 = vadd.f32 %v2981_v55, %v1719_v45  ;;  %v3188_v45 = vld [vmem:[%s5443_s16 + $0x30] sm:$0xff] }
 0x38e   : > { %v3027_v34 = vadd.f32 %v3997_v29, %v3538_v8  ;;  %v3034_v2 = vmax.f32 %v3026_v13, 0.0 }
 0x38f   : > { %v3025_v46 = vadd.f32 %v3998_v31, %v3538_v8  ;;  %v3032_v35 = vmax.f32 %v3024_v49, 0.0 }
 0x390   : > { %v3035_v37 = vmax.f32 %v3027_v34, 0.0 }
 0x391   : > { %v3033_v61 = vmax.f32 %v3025_v46, 0.0  ;;  %v3969_v7 = vpop.f32.mrb[4].mxu1 }
 0x392   : > { %v3041_v22 = vpack.c.bf16 %v3035_v37, %v3034_v2  ;;  %v3999_v30 = vadd.f32 %v3969_v7, %v3825_v12  ;;  %v2994_v50 = vpop.f32.mrb[5].mxu1 }
 0x393   : > { %v4000_v18 = vadd.f32 %v2994_v50, %v1732_v62  ;;  %v3970_v36 = vpop.f32.mrb[6].mxu1  ;;  %v3040_v39 = vpack.c.bf16 %v3033_v61, %v3032_v35 }
 0x394   : > { %v3030_v42 = vadd.f32 %v3999_v30, %v3538_v8  ;;  %v4001_v40 = vadd.f32 %v3970_v36, %v3826_v20  ;;  %v2997_v0 = vpop.f32.mrb[7].mxu1  ;;  %v3186_v20 = vld [vmem:[%s5443_s16 + $0x20] sm:$0xff] }
 0x395   : > { %v3028_v52 = vadd.f32 %v4000_v18, %v3538_v8  ;;  %v4002_v53 = vadd.f32 %v2997_v0, %v1735_v17  ;;  %3987 = vmatprep.mubr.bf16.mxu0 %v3040_v39 }
 0x396   : > { %v3031_v44 = vadd.f32 %v4001_v40, %v3538_v8  ;;  %3988 = vmatmul.mubr.bf16.vlgmr.msra.gmra.mrb[20].mxu0 %v3041_v22  ;;  %v3038_v54 = vmax.f32 %v3030_v42, 0.0 }
 0x397   : > { %v3029_v41 = vadd.f32 %v4002_v53, %v3538_v8  ;;  %v3036_v60 = vmax.f32 %v3028_v52, 0.0  ;;  %v3189_v8 = vld [vmem:[%s5443_s16 + $0x38] sm:$0xff]  ;;  %s4414_s16 = scalar_lea.vmem %s5469_s12, 1024 }
 0x398   : > { %v3039_v59 = vmax.f32 %v3031_v44, 0.0  ;;  %p4415_p12 = scmp.ne.s32.totalorder %s5469_s12, %s4414_s16  ;;  %p4422_p1 = scmp.lt.s32.totalorder %s4420_s5, %s4414_s16 }
 0x399   : > { %v3037_v63 = vmax.f32 %v3029_v41, 0.0 }
 0x39a   : > { %v3043_v51 = vpack.c.bf16 %v3039_v59, %v3038_v54  ;;  %p4416_p7 = pnand %p4415_p12, %p5607_p4  ;;  %p4423_p11 = por %p4422_p1, %p4421_p0 }
 0x39b   : > { %v3042_v32 = vpack.c.bf16 %v3037_v63, %v3036_v60 }
 0x39c   : > { %p4417_p3 = pneg %p4416_p7 }
 0x39d   : > { %3991 = vmatprep.mubr.bf16.mxu0 %v3042_v32 }
 0x39e   : > { %3992 = vmatmul.mubr.bf16.gmra.mrb[24].mxu0 %v3043_v51  ;;  %p4424_p10 = pnand %p4423_p11, %p4417_p3 }
 0x469   : > { %v3989_v1 = vpop.f32.mrb[20].mxu0 }
 0x46a   : > { %v3158_v57 = vadd.f32 %v3989_v1, %v3539_v47  ;;  %v3149_v38 = vpop.f32.mrb[21].mxu0 }
 0x46b   : > { %v3150_v48 = vadd.f32 %v3539_v47, %v3149_v38  ;;  %v3990_v4 = vpop.f32.mrb[22].mxu0 }
 0x46c   : > { %v3192_v43 = vadd.f32 %v3184_v56, %v3158_v57  ;;  %v3161_v5 = vadd.f32 %v3990_v4, %v3539_v47  ;;  %v3152_v10 = vpop.f32.mrb[23].mxu0 }
 0x46d   : > { %v3190_v11 = vadd.f32 %v3182_v3, %v3150_v48  ;;  %v3153_v6 = vadd.f32 %v3539_v47, %v3152_v10 }
 0x46e   : > { %v3200_v24 = vmax.f32 %v3192_v43, 0.0  ;;  %v3193_v25 = vadd.f32 %v3185_v33, %v3161_v5 }
 0x46f   : > { %v3198_v23 = vmax.f32 %v3190_v11, 0.0  ;;  %v3191_v14 = vadd.f32 %v3183_v9, %v3153_v6 }
 0x470   : > { %3208 = vst [vmem:[%s4971_s8 + $0x10] sm:$0xff] %v3200_v24  ;;  %v3201_v19 = vmax.f32 %v3193_v25, 0.0 }
 0x471   : > { %3206 = vst [vmem:[%s4971_s8] sm:$0xff] %v3198_v23  ;;  %v3199_v15 = vmax.f32 %v3191_v14, 0.0  ;;  %v3993_v16 = vpop.f32.mrb[24].mxu0 }
 0x472   : > { %3209 = vst [vmem:[%s4971_s8 + $0x18] sm:$0xff] %v3201_v19  ;;  %v3174_v12 = vadd.f32 %v3993_v16, %v3539_v47  ;;  %v3165_v62 = vpop.f32.mrb[25].mxu0 }
 0x473   : > { %3207 = vst [vmem:[%s4971_s8 + $0x8] sm:$0xff] %v3199_v15  ;;  %v3166_v17 = vadd.f32 %v3539_v47, %v3165_v62  ;;  %v3994_v58 = vpop.f32.mrb[26].mxu0 }
 0x474   : > { %v3196_v21 = vadd.f32 %v3188_v45, %v3174_v12  ;;  %v3177_v26 = vadd.f32 %v3994_v58, %v3539_v47  ;;  %v3168_v27 = vpop.f32.mrb[27].mxu0 }
 0x475   : > { %v3194_v13 = vadd.f32 %v3186_v20, %v3166_v17  ;;  %v3169_v29 = vadd.f32 %v3539_v47, %v3168_v27 }
 0x476   : > { %v3204_v55 = vmax.f32 %v3196_v21, 0.0  ;;  %v3197_v49 = vadd.f32 %v3189_v8, %v3177_v26 }
 0x477   : > { %v3202_v31 = vmax.f32 %v3194_v13, 0.0  ;;  %v3195_v34 = vadd.f32 %v3187_v28, %v3169_v29 }
 0x478   : > { %3212 = vst [vmem:[%s4971_s8 + $0x30] sm:$0xff] %v3204_v55  ;;  %v3205_v46 = vmax.f32 %v3197_v49, 0.0 }
 0x479   : > { %3210 = vst [vmem:[%s4971_s8 + $0x20] sm:$0xff] %v3202_v31  ;;  %v3203_v2 = vmax.f32 %v3195_v34, 0.0 }
 0x47a   : > { %3213 = vst [vmem:[%s4971_s8 + $0x38] sm:$0xff] %v3205_v46 }
 0x47b   : > { %3211 = vst [vmem:[%s4971_s8 + $0x28] sm:$0xff] %v3203_v2 }
 0x47c   : > { %4427 = shalt.err (!%p4424_p10)
}
 0x47d   : > { %s4428_s2 = scalar_lea.hbm %s5467_s18, 1024  ;;  %s4432_s13 = scalar_lea.hbm %s5606_s15, 8192 }
 0x47e   : > { %p4429_p2 = scmp.ne.s32.totalorder %s5467_s18, %s4428_s2  ;;  %p4433_p13 = scmp.lt.u32.totalorder %s5467_s18, %s5606_s15 }
 0x47f   : > { %p4434_p6 = scmp.lt.u32.totalorder %s4432_s13, %s4428_s2  ;;  %p4436_p12 = scmp.lt.u32.totalorder %s4428_s2, %s5467_s18 }
 0x480   : > { %p4430_p9 = pnand %p4429_p2, %p5607_p4 }
 0x481   : > { %p4435_p8 = por %p4434_p6, %p4433_p13 }
 0x482   : > { %p4431_p5 = pneg %p4430_p9 }
 0x483   : > { %p4437_p7 = por %p4436_p12, %p4435_p8 }
 0x485   : > { %p4438_p3 = pnand %p4437_p7, %p4431_p5 }
 0x487   : > { %4441 = shalt.err (!%p4438_p3)
}
 0x488   : > { %s4557_s30 = smov 128   ;;  %s4558_s27 = smov 8  }
 0x489   : > { %4073 = dma.vmem_to_hbm [thread:$0]  (%p5607_p4), %s5469_s12, 1024, %s5467_s18, %s5476_s19, %s4557_s30, %s4557_s30, %s4558_s27  }
 0x48a PF: > { %s5608_s1 = sld [smem:[#allocation16_spill]]  ;;  %s5609_s16 = sld [smem:[#allocation19_spill]] }
 0x48b   : > { %p4100_p0 = scmp.ge.s32.totalorder %s4544_s11, 2 }
 0x490   : > { %s3246_s4 = sand.u32 1, %s5608_s1   ;;  %p5610_p1 = scmp.ne.s32.totalorder %s5609_s16, 0 }
 0x491   : > { %s3247_s14 = scalar_lea.sflag [#allocation5], %s3246_s4 }
 0x492   : > { %p4090_p11 = pnand %p4100_p0, %p5610_p1 }
 0x494   : > { %4499 = dma.done.wait (!%p4090_p11), %s3247_s14, 1024  }
 0x495   : > { %4501 = vsyncadd (!%p4090_p11), %s3247_s14, 4294966272  ;;  %s25_s11 = sadd.s32 1, %s4544_s11   ;;  %s5611_s24 = smov %s4508_s25 }
 0x496   : > { %p22_p10 = scmp.ge.s32.totalorder %s25_s11, 10   ;;  %s5612_s25 = smov %s4512_s26 }
 0x497   : > { %s5613_s26 = smov %s4806_s7  ;;  %s5614_s27 = smov %s4520_s28 }
 0x498   : > { %s5615_s28 = smov %s4524_s29  ;;  %s5616_s29 = smov %s4801_s23 }
 0x499   : > { %s5617_s30 = smov %s4536_s9  ;;  %s5618_s8 = smov %s4540_s10 }
 0x49a   : > { %s5619_s9 = smov %s5622_s17  ;;  %s5620_s10 = smov %s5626_s22 }
 0x49b   :  { %24 = sbr.rel (!%p22_p10) target bundleno = 18 (0x12), region = 131 }
 0x4a2   :  { %3252 = vsyncpa [#allocation4], 1 }
 0x4a3   :  { %3254 = vsyncpa [#allocation4 + $0x1], 1 }
 0x4a4   :  { %3255 = vsyncpa [#allocation7], 1 }
 0x4a5   :  { %3256 = vsyncpa [#allocation10], 1 }
 0x4a6   :  { %3257 = vsyncpa [#allocation5], 1 }
 0x4a7   :  { %3259 = vsyncpa [#allocation5 + $0x1], 1 }

</bundles_post_ra>
